<compile_context>
chip_gen: v5e
topology: v5e:2x2
jax: 0.10.0
libtpu: 0.0.40
codegen_flags: <defaults>
</compile_context>

<pallas_src>
import jax
import jax.numpy as jnp
from jax.experimental import pallas as pl
from jax.experimental.pallas import tpu as pltpu

K = 16                  # conv kernel size for conv1 / conv2
PAD_L, PAD_R = 7, 8     # PyTorch padding='same' split for an even kernel (k-1=15)
GUARD = 16              # per-sample zero guard band; 16 >= largest tap offset
HI = jax.lax.Precision.HIGHEST   # used only by the pure-JAX reference


def simplified_attention_unet(x, params, block_n=None):
    """Forward pass of SimplifiedAttentionUNet as one Pallas TPU kernel."""
    (w1, b1, wa11, ba11, wa12, ba12,
     w2, b2, wa21, ba21, wa22, ba22, wo, bo) = params
    N, c_in, L = x.shape
    assert c_in == 1 and L % 2 == 0

    f32, bf16 = jnp.float32, jnp.bfloat16
    Lp = L + 2 * GUARD                         # padded per-sample frame (even)

    # ---- choose how many samples to pack into the lane dim per grid step ----
    if block_n is None:
        cap = max(1, 1024 // Lp)               # keep intermediates in vregs
        divs = [d for d in range(1, N + 1) if N % d == 0 and d <= cap]
        pref = [d for d in divs if N // d >= 2]   # keep >=2 grid steps (v7x)
        block_n = max(pref) if pref else max(divs)
    assert N % block_n == 0
    Ng = N // block_n
    W = block_n * Lp                           # lanes per grid step

    # ---- host-side packing --------------------------------------------------
    xp = jnp.pad(x.astype(f32), ((0, 0), (0, 0), (GUARD, GUARD)))   # (N,1,Lp)
    xp = xp.reshape(Ng, 1, W)                                       # lane-batched

    # all matmul weights in one f32 slab (all row starts are multiples of 8,
    # all slices start at lane 0)
    w2p = jnp.transpose(w2, (0, 2, 1)).reshape(16, K * 8)   # col = tap*8 + cin
    wslab = jnp.zeros((112, 128), f32)
    wslab = wslab.at[0:8, 0:K].set(w1.reshape(8, K).astype(f32))
    for c in range(4):                                       # conv2: 4 taps/chunk
        wslab = wslab.at[8 + 16 * c:24 + 16 * c, 0:32].set(
            w2p[:, 32 * c:32 * c + 32].astype(f32))
    wslab = wslab.at[72:76, 0:8].set(wa11.reshape(4, 8).astype(f32))
    wslab = wslab.at[80:81, 0:4].set(wa12.reshape(1, 4).astype(f32))
    wslab = wslab.at[88:96, 0:16].set(wa21.reshape(8, 16).astype(f32))
    wslab = wslab.at[96:97, 0:8].set(wa22.reshape(1, 8).astype(f32))
    wslab = wslab.at[104:107, 0:16].set(wo.reshape(3, 16).astype(f32))

    # all biases as column vectors in one (64, 1) slab
    bslab = jnp.zeros((64, 1), f32)
    bslab = bslab.at[0:16, 0].set(b2.astype(f32))
    bslab = bslab.at[16:24, 0].set(b1.astype(f32))
    bslab = bslab.at[24:28, 0].set(ba11.astype(f32))
    bslab = bslab.at[32:33, 0].set(ba12.astype(f32))
    bslab = bslab.at[40:48, 0].set(ba21.astype(f32))
    bslab = bslab.at[48:49, 0].set(ba22.astype(f32))
    bslab = bslab.at[56:59, 0].set(bo.astype(f32))

    # ---- the kernel ----------------------------------------------------------
    def kernel(x_ref, w_ref, b_ref, out_ref):
        x = x_ref[0]                                         # (1, W) f32

        def rd(v, shift):
            # rd(v, s)[:, l] = v[:, (l + s) % W]   (pure lane rotation, no mask;
            # the zero guard bands make the circular wrap harmless)
            s = (-shift) % W
            return v if s == 0 else pltpu.roll(v, shift=s, axis=1)

        # conv1: Conv1d(1, 8, k=16, 'same') as one (8,16)@(16,W) matmul.
        taps1 = jnp.concatenate([rd(x, t - PAD_L) for t in range(K)], axis=0)
        y1 = jnp.dot(w_ref[0:8, 0:K].astype(bf16), taps1.astype(bf16),
                     preferred_element_type=f32) + b_ref[16:24, 0:1]       # (8, W)

        # att1: 1x1 convs 8 -> 4 -> 1, ReLU / sigmoid gate.
        h1 = jnp.maximum(
            jnp.dot(w_ref[72:76, 0:8].astype(bf16), y1.astype(bf16),
                    preferred_element_type=f32) + b_ref[24:28, 0:1], 0.0)  # (4, W)
        a1 = jax.nn.sigmoid(
            jnp.dot(w_ref[80:81, 0:4].astype(bf16), h1.astype(bf16),
                    preferred_element_type=f32) + b_ref[32:33, 0:1])       # (1, W)

        # Gate, and zero the guard lanes so conv2's 'same' padding sees zeros.
        lane = jax.lax.broadcasted_iota(jnp.int32, (1, W), 1)
        in_sample = (lane >= GUARD) & (lane < GUARD + L)
        for s in range(1, block_n):
            base = s * Lp
            in_sample = in_sample | ((lane >= base + GUARD) &
                                     (lane < base + GUARD + L))
        x1a = jnp.where(in_sample, y1 * a1, 0.0)             # (8, W)

        # MaxPool1d(2) kept at full resolution: even lanes hold pooled values.
        m = jnp.maximum(x1a, rd(x1a, 1))                     # (8, W)

        # conv2: Conv1d(8, 16, k=16, 'same') on the pooled signal, evaluated as
        # a dilation-2 tap conv, accumulated 4 taps per MXU matmul.
        y2 = jnp.zeros((16, W), f32)
        for c in range(4):
            blk = jnp.concatenate(
                [rd(m, 2 * (4 * c + j) - 2 * PAD_L) for j in range(4)], axis=0)
            y2 = y2 + jnp.dot(w_ref[8 + 16 * c:24 + 16 * c, 0:32].astype(bf16),
                              blk.astype(bf16), preferred_element_type=f32)
        y2 = y2 + b_ref[0:16, 0:1]                           # (16, W)

        # att2: 1x1 convs 16 -> 8 -> 1.
        h2 = jnp.maximum(
            jnp.dot(w_ref[88:96, 0:16].astype(bf16), y2.astype(bf16),
                    preferred_element_type=f32) + b_ref[40:48, 0:1], 0.0)  # (8, W)
        a2 = jax.nn.sigmoid(
            jnp.dot(w_ref[96:97, 0:8].astype(bf16), h2.astype(bf16),
                    preferred_element_type=f32) + b_ref[48:49, 0:1])       # (1, W)
        x2a = y2 * a2                                        # (16, W)

        # out_conv (1x1, 16 -> 3) + softmax over channels (row-sliced, VPU).
        logits = jnp.dot(w_ref[104:107, 0:16].astype(bf16), x2a.astype(bf16),
                         preferred_element_type=f32) + b_ref[56:59, 0:1]   # (3, W)
        mx = jnp.maximum(jnp.maximum(logits[0:1], logits[1:2]), logits[2:3])
        e = jnp.exp(logits - mx)
        denom = e[0:1] + e[1:2] + e[2:3]
        sm = e * pl.reciprocal(denom, approx=True)

        # nearest Upsample(x2): odd lanes copy their left (even) neighbour.
        shifted = pltpu.roll(sm, shift=1, axis=1)
        out = jnp.where((lane & 1) == 0, sm, shifted)
        out_ref[0] = out.astype(out_ref.dtype)

    out_padded = pl.pallas_call(
        kernel,
        out_shape=jax.ShapeDtypeStruct((Ng, 3, W), f32),
        grid_spec=pltpu.PrefetchScalarGridSpec(
            num_scalar_prefetch=0,
            grid=(Ng,),
            in_specs=[
                pl.BlockSpec((1, 1, W), lambda g: (g, 0, 0)),     # lane-batched x
                pl.BlockSpec((112, 128), lambda g: (0, 0)),       # weight slab
                pl.BlockSpec((64, 1), lambda g: (0, 0)),          # bias slab
            ],
            out_specs=pl.BlockSpec((1, 3, W), lambda g: (g, 0, 0)),
        ),
        compiler_params=pltpu.CompilerParams(
            dimension_semantics=("parallel",)),
    )(xp, wslab, bslab)

    # un-batch the lanes and strip the guard bands
    out = out_padded.reshape(Ng, 3, block_n, Lp)
    out = jnp.transpose(out, (0, 2, 1, 3)).reshape(N, 3, Lp)
    return out[:, :, GUARD:GUARD + L]


# ---------------- pure-JAX reference (mirrors the PyTorch module) ----------------
def reference(x, params):
    (w1, b1, wa11, ba11, wa12, ba12,
     w2, b2, wa21, ba21, wa22, ba22, wo, bo) = params

    def conv1d_same(x, w, b):
        xp = jnp.pad(x, ((0, 0), (0, 0), (PAD_L, PAD_R)))
        y = jax.lax.conv_general_dilated(
            xp, w, (1,), 'VALID',
            dimension_numbers=('NCH', 'OIH', 'NCH'), precision=HI)
        return y + b[None, :, None]

    def conv1x1(x, w, b):
        return jnp.einsum('oi,nil->nol', w[:, :, 0], x, precision=HI) + b[None, :, None]

    def attention(x, wA, bA, wB, bB):
        h = jax.nn.relu(conv1x1(x, wA, bA))
        a = jax.nn.sigmoid(conv1x1(h, wB, bB))
        return x * a

    x1 = conv1d_same(x, w1, b1)
    x1a = attention(x1, wa11, ba11, wa12, ba12)
    x2 = jnp.maximum(x1a[:, :, 0::2], x1a[:, :, 1::2])        # MaxPool1d(2)
    x2 = conv1d_same(x2, w2, b2)
    x2a = attention(x2, wa21, ba21, wa22, ba22)
    xup = jnp.repeat(x2a, 2, axis=-1)                          # nearest upsample x2
    logits = conv1x1(xup, wo, bo)
    return jax.nn.softmax(logits, axis=1)


def init_params(key):
    ks = jax.random.split(key, 14)
    w = lambda k, shape, s: (s * jax.random.normal(k, shape)).astype(jnp.float32)
    return (
        w(ks[0], (8, 1, K), 0.25),   w(ks[1], (8,), 0.1),     # conv1
        w(ks[2], (4, 8, 1), 0.30),   w(ks[3], (4,), 0.1),     # att1 conv a
        w(ks[4], (1, 4, 1), 0.30),   w(ks[5], (1,), 0.1),     # att1 conv b
        w(ks[6], (16, 8, K), 0.08),  w(ks[7], (16,), 0.1),    # conv2
        w(ks[8], (8, 16, 1), 0.20),  w(ks[9], (8,), 0.1),     # att2 conv a
        w(ks[10], (1, 8, 1), 0.30),  w(ks[11], (1,), 0.1),    # att2 conv b
        w(ks[12], (3, 16, 1), 0.30), w(ks[13], (3,), 0.1),    # out_conv
    )


if __name__ == "__main__":
    key = jax.random.PRNGKey(0)
    kx, kp = jax.random.split(key)
    N, L = 4, 256
    x = jax.random.normal(kx, (N, 1, L), dtype=jnp.float32)
    params = init_params(kp)

    out = simplified_attention_unet(x, params)     # packs 2 samples/step, grid=2
    out = jax.block_until_ready(out)
    assert out.shape == (N, 3, L)

    ref = reference(x, params)
    err = float(jnp.max(jnp.abs(out - ref)))
    if err > 2e-2:     # bf16 matmul operands + approx reciprocal vs exact f32 reference
        raise AssertionError(f"mismatch vs reference: max abs err {err}")
    print("KERNEL_OK")
</pallas_src>

<mosaic_0001>
module attributes {stable_mosaic.version = 11 : i64} {
  func.func @kernel(%arg0: i32, %arg1: memref<1x1x576xf32, #tpu.memory_space<vmem>>, %arg2: memref<112x128xf32, #tpu.memory_space<vmem>>, %arg3: memref<64x1xf32, #tpu.memory_space<vmem>>, %arg4: memref<1x3x576xf32, #tpu.memory_space<vmem>>) attributes {dimension_semantics = [#tpu.dimension_semantics<parallel>], iteration_bounds = array<i64: 2>, scalar_prefetch = 0 : i64, scratch_operands = 0 : i64, tpu.core_type = #tpu.core_type<tc>, window_params = [{transform_indices = @transform_0, window_bounds = array<i64: 1, 1, 576>}, {pipeline_mode = #tpu.pipeline_mode<synchronous>, transform_indices = @transform_1, window_bounds = array<i64: 112, 128>}, {pipeline_mode = #tpu.pipeline_mode<synchronous>, transform_indices = @transform_2, window_bounds = array<i64: 64, 1>}, {transform_indices = @transform_3, window_bounds = array<i64: 1, 3, 576>}]} {
    %c0 = arith.constant 0 : index
    %c0_0 = arith.constant 0 : index
    %c0_1 = arith.constant 0 : index
    %0 = vector.load %arg1[%c0, %c0_0, %c0_1] : memref<1x1x576xf32, #tpu.memory_space<vmem>>, vector<1x1x576xf32>
    %1 = vector.shape_cast %0 : vector<1x1x576xf32> to vector<1x576xf32>
    %c7_i32 = arith.constant 7 : i32
    %2 = tpu.dynamic_rotate %1 by %c7_i32 dim 1 : vector<1x576xf32>, i32 -> vector<1x576xf32>
    %c6_i32 = arith.constant 6 : i32
    %3 = tpu.dynamic_rotate %1 by %c6_i32 dim 1 : vector<1x576xf32>, i32 -> vector<1x576xf32>
    %c5_i32 = arith.constant 5 : i32
    %4 = tpu.dynamic_rotate %1 by %c5_i32 dim 1 : vector<1x576xf32>, i32 -> vector<1x576xf32>
    %c4_i32 = arith.constant 4 : i32
    %5 = tpu.dynamic_rotate %1 by %c4_i32 dim 1 : vector<1x576xf32>, i32 -> vector<1x576xf32>
    %c3_i32 = arith.constant 3 : i32
    %6 = tpu.dynamic_rotate %1 by %c3_i32 dim 1 : vector<1x576xf32>, i32 -> vector<1x576xf32>
    %c2_i32 = arith.constant 2 : i32
    %7 = tpu.dynamic_rotate %1 by %c2_i32 dim 1 : vector<1x576xf32>, i32 -> vector<1x576xf32>
    %c1_i32 = arith.constant 1 : i32
    %8 = tpu.dynamic_rotate %1 by %c1_i32 dim 1 : vector<1x576xf32>, i32 -> vector<1x576xf32>
    %c575_i32 = arith.constant 575 : i32
    %9 = tpu.dynamic_rotate %1 by %c575_i32 dim 1 : vector<1x576xf32>, i32 -> vector<1x576xf32>
    %c574_i32 = arith.constant 574 : i32
    %10 = tpu.dynamic_rotate %1 by %c574_i32 dim 1 : vector<1x576xf32>, i32 -> vector<1x576xf32>
    %c573_i32 = arith.constant 573 : i32
    %11 = tpu.dynamic_rotate %1 by %c573_i32 dim 1 : vector<1x576xf32>, i32 -> vector<1x576xf32>
    %c572_i32 = arith.constant 572 : i32
    %12 = tpu.dynamic_rotate %1 by %c572_i32 dim 1 : vector<1x576xf32>, i32 -> vector<1x576xf32>
    %c571_i32 = arith.constant 571 : i32
    %13 = tpu.dynamic_rotate %1 by %c571_i32 dim 1 : vector<1x576xf32>, i32 -> vector<1x576xf32>
    %c570_i32 = arith.constant 570 : i32
    %14 = tpu.dynamic_rotate %1 by %c570_i32 dim 1 : vector<1x576xf32>, i32 -> vector<1x576xf32>
    %c569_i32 = arith.constant 569 : i32
    %15 = tpu.dynamic_rotate %1 by %c569_i32 dim 1 : vector<1x576xf32>, i32 -> vector<1x576xf32>
    %c568_i32 = arith.constant 568 : i32
    %16 = tpu.dynamic_rotate %1 by %c568_i32 dim 1 : vector<1x576xf32>, i32 -> vector<1x576xf32>
    %17 = tpu.concatenate %2, %3, %4, %5, %6, %7, %8, %1, %9, %10, %11, %12, %13, %14, %15, %16 in 0 : vector<1x576xf32>, vector<1x576xf32>, vector<1x576xf32>, vector<1x576xf32>, vector<1x576xf32>, vector<1x576xf32>, vector<1x576xf32>, vector<1x576xf32>, vector<1x576xf32>, vector<1x576xf32>, vector<1x576xf32>, vector<1x576xf32>, vector<1x576xf32>, vector<1x576xf32>, vector<1x576xf32>, vector<1x576xf32> -> vector<16x576xf32>
    %c0_2 = arith.constant 0 : index
    %c0_3 = arith.constant 0 : index
    %18 = vector.load %arg2[%c0_2, %c0_3] : memref<112x128xf32, #tpu.memory_space<vmem>>, vector<8x16xf32>
    %19 = arith.truncf %18 : vector<8x16xf32> to vector<8x16xbf16>
    %20 = arith.truncf %17 : vector<16x576xf32> to vector<16x576xbf16>
    %cst = arith.constant dense<0.000000e+00> : vector<8x576xf32>
    %21 = tpu.matmul %19, %20, %cst {dimension_numbers = #tpu.dot_dimension_numbers<[1], [0], [0], [1], [0, 0, 1, 1], [], []>} : vector<8x16xbf16>, vector<16x576xbf16>, vector<8x576xf32> -> vector<8x576xf32>
    %c16 = arith.constant 16 : index
    %c0_4 = arith.constant 0 : index
    %22 = vector.load %arg3[%c16, %c0_4] : memref<64x1xf32, #tpu.memory_space<vmem>>, vector<8x1xf32>
    %23 = vector.broadcast %22 : vector<8x1xf32> to vector<8x576xf32>
    %24 = arith.addf %21, %23 : vector<8x576xf32>
    %c72 = arith.constant 72 : index
    %c0_5 = arith.constant 0 : index
    %25 = vector.load %arg2[%c72, %c0_5] : memref<112x128xf32, #tpu.memory_space<vmem>>, vector<4x8xf32>
    %26 = arith.truncf %25 : vector<4x8xf32> to vector<4x8xbf16>
    %27 = arith.truncf %24 : vector<8x576xf32> to vector<8x576xbf16>
    %cst_6 = arith.constant dense<0.000000e+00> : vector<4x576xf32>
    %28 = tpu.matmul %26, %27, %cst_6 {dimension_numbers = #tpu.dot_dimension_numbers<[1], [0], [0], [1], [0, 0, 1, 1], [], []>} : vector<4x8xbf16>, vector<8x576xbf16>, vector<4x576xf32> -> vector<4x576xf32>
    %c24 = arith.constant 24 : index
    %c0_7 = arith.constant 0 : index
    %29 = vector.load %arg3[%c24, %c0_7] : memref<64x1xf32, #tpu.memory_space<vmem>>, vector<4x1xf32>
    %30 = vector.broadcast %29 : vector<4x1xf32> to vector<4x576xf32>
    %31 = arith.addf %28, %30 : vector<4x576xf32>
    %cst_8 = arith.constant 0.000000e+00 : f32
    %32 = vector.broadcast %cst_8 : f32 to vector<4x576xf32>
    %33 = arith.maximumf %31, %32 : vector<4x576xf32>
    %c80 = arith.constant 80 : index
    %c0_9 = arith.constant 0 : index
    %34 = vector.load %arg2[%c80, %c0_9] : memref<112x128xf32, #tpu.memory_space<vmem>>, vector<1x4xf32>
    %35 = arith.truncf %34 : vector<1x4xf32> to vector<1x4xbf16>
    %36 = arith.truncf %33 : vector<4x576xf32> to vector<4x576xbf16>
    %cst_10 = arith.constant dense<0.000000e+00> : vector<1x576xf32>
    %37 = tpu.matmul %35, %36, %cst_10 {dimension_numbers = #tpu.dot_dimension_numbers<[1], [0], [0], [1], [0, 0, 1, 1], [], []>} : vector<1x4xbf16>, vector<4x576xbf16>, vector<1x576xf32> -> vector<1x576xf32>
    %c32 = arith.constant 32 : index
    %c0_11 = arith.constant 0 : index
    %38 = vector.load %arg3[%c32, %c0_11] : memref<64x1xf32, #tpu.memory_space<vmem>>, vector<1x1xf32>
    %39 = vector.broadcast %38 : vector<1x1xf32> to vector<1x576xf32>
    %40 = arith.addf %37, %39 : vector<1x576xf32>
    %41 = arith.negf %40 : vector<1x576xf32>
    %42 = math.exp %41 : vector<1x576xf32>
    %cst_12 = arith.constant 1.000000e+00 : f32
    %43 = vector.broadcast %cst_12 : f32 to vector<1x576xf32>
    %44 = arith.addf %43, %42 : vector<1x576xf32>
    %45 = arith.divf %43, %44 : vector<1x576xf32>
    %46 = tpu.iota {dimensions = array<i32: 1>} : vector<1x576xi32>
    %c16_i32 = arith.constant 16 : i32
    %47 = vector.broadcast %c16_i32 : i32 to vector<1x576xi32>
    %48 = arith.cmpi sge, %46, %47 : vector<1x576xi32>
    %c272_i32 = arith.constant 272 : i32
    %49 = vector.broadcast %c272_i32 : i32 to vector<1x576xi32>
    %50 = arith.cmpi slt, %46, %49 : vector<1x576xi32>
    %51 = arith.andi %48, %50 : vector<1x576xi1>
    %c304_i32 = arith.constant 304 : i32
    %52 = vector.broadcast %c304_i32 : i32 to vector<1x576xi32>
    %53 = arith.cmpi sge, %46, %52 : vector<1x576xi32>
    %c560_i32 = arith.constant 560 : i32
    %54 = vector.broadcast %c560_i32 : i32 to vector<1x576xi32>
    %55 = arith.cmpi slt, %46, %54 : vector<1x576xi32>
    %56 = arith.andi %53, %55 : vector<1x576xi1>
    %57 = arith.ori %51, %56 : vector<1x576xi1>
    %58 = vector.broadcast %45 : vector<1x576xf32> to vector<8x576xf32>
    %59 = arith.mulf %24, %58 : vector<8x576xf32>
    %cst_13 = arith.constant 0.000000e+00 : f32
    %60 = vector.shape_cast %57 : vector<1x576xi1> to vector<1x576xi1>
    %61 = vector.broadcast %60 : vector<1x576xi1> to vector<8x576xi1>
    %62 = vector.broadcast %cst_13 : f32 to vector<8x576xf32>
    %63 = arith.select %61, %59, %62 : vector<8x576xi1>, vector<8x576xf32>
    %c575_i32_14 = arith.constant 575 : i32
    %64 = tpu.dynamic_rotate %63 by %c575_i32_14 dim 1 : vector<8x576xf32>, i32 -> vector<8x576xf32>
    %65 = arith.maximumf %63, %64 : vector<8x576xf32>
    %cst_15 = arith.constant 0.000000e+00 : f32
    %66 = vector.broadcast %cst_15 : f32 to vector<16x576xf32>
    %c14_i32 = arith.constant 14 : i32
    %67 = tpu.dynamic_rotate %65 by %c14_i32 dim 1 : vector<8x576xf32>, i32 -> vector<8x576xf32>
    %c12_i32 = arith.constant 12 : i32
    %68 = tpu.dynamic_rotate %65 by %c12_i32 dim 1 : vector<8x576xf32>, i32 -> vector<8x576xf32>
    %c10_i32 = arith.constant 10 : i32
    %69 = tpu.dynamic_rotate %65 by %c10_i32 dim 1 : vector<8x576xf32>, i32 -> vector<8x576xf32>
    %c8_i32 = arith.constant 8 : i32
    %70 = tpu.dynamic_rotate %65 by %c8_i32 dim 1 : vector<8x576xf32>, i32 -> vector<8x576xf32>
    %71 = tpu.concatenate %67, %68, %69, %70 in 0 : vector<8x576xf32>, vector<8x576xf32>, vector<8x576xf32>, vector<8x576xf32> -> vector<32x576xf32>
    %c8 = arith.constant 8 : index
    %c0_16 = arith.constant 0 : index
    %72 = vector.load %arg2[%c8, %c0_16] : memref<112x128xf32, #tpu.memory_space<vmem>>, vector<16x32xf32>
    %73 = arith.truncf %72 : vector<16x32xf32> to vector<16x32xbf16>
    %74 = arith.truncf %71 : vector<32x576xf32> to vector<32x576xbf16>
    %cst_17 = arith.constant dense<0.000000e+00> : vector<16x576xf32>
    %75 = tpu.matmul %73, %74, %cst_17 {dimension_numbers = #tpu.dot_dimension_numbers<[1], [0], [0], [1], [0, 0, 1, 1], [], []>} : vector<16x32xbf16>, vector<32x576xbf16>, vector<16x576xf32> -> vector<16x576xf32>
    %76 = arith.addf %66, %75 : vector<16x576xf32>
    %c6_i32_18 = arith.constant 6 : i32
    %77 = tpu.dynamic_rotate %65 by %c6_i32_18 dim 1 : vector<8x576xf32>, i32 -> vector<8x576xf32>
    %c4_i32_19 = arith.constant 4 : i32
    %78 = tpu.dynamic_rotate %65 by %c4_i32_19 dim 1 : vector<8x576xf32>, i32 -> vector<8x576xf32>
    %c2_i32_20 = arith.constant 2 : i32
    %79 = tpu.dynamic_rotate %65 by %c2_i32_20 dim 1 : vector<8x576xf32>, i32 -> vector<8x576xf32>
    %80 = tpu.concatenate %77, %78, %79, %65 in 0 : vector<8x576xf32>, vector<8x576xf32>, vector<8x576xf32>, vector<8x576xf32> -> vector<32x576xf32>
    %c24_21 = arith.constant 24 : index
    %c0_22 = arith.constant 0 : index
    %81 = vector.load %arg2[%c24_21, %c0_22] : memref<112x128xf32, #tpu.memory_space<vmem>>, vector<16x32xf32>
    %82 = arith.truncf %81 : vector<16x32xf32> to vector<16x32xbf16>
    %83 = arith.truncf %80 : vector<32x576xf32> to vector<32x576xbf16>
    %cst_23 = arith.constant dense<0.000000e+00> : vector<16x576xf32>
    %84 = tpu.matmul %82, %83, %cst_23 {dimension_numbers = #tpu.dot_dimension_numbers<[1], [0], [0], [1], [0, 0, 1, 1], [], []>} : vector<16x32xbf16>, vector<32x576xbf16>, vector<16x576xf32> -> vector<16x576xf32>
    %85 = arith.addf %76, %84 : vector<16x576xf32>
    %c574_i32_24 = arith.constant 574 : i32
    %86 = tpu.dynamic_rotate %65 by %c574_i32_24 dim 1 : vector<8x576xf32>, i32 -> vector<8x576xf32>
    %c572_i32_25 = arith.constant 572 : i32
    %87 = tpu.dynamic_rotate %65 by %c572_i32_25 dim 1 : vector<8x576xf32>, i32 -> vector<8x576xf32>
    %c570_i32_26 = arith.constant 570 : i32
    %88 = tpu.dynamic_rotate %65 by %c570_i32_26 dim 1 : vector<8x576xf32>, i32 -> vector<8x576xf32>
    %c568_i32_27 = arith.constant 568 : i32
    %89 = tpu.dynamic_rotate %65 by %c568_i32_27 dim 1 : vector<8x576xf32>, i32 -> vector<8x576xf32>
    %90 = tpu.concatenate %86, %87, %88, %89 in 0 : vector<8x576xf32>, vector<8x576xf32>, vector<8x576xf32>, vector<8x576xf32> -> vector<32x576xf32>
    %c40 = arith.constant 40 : index
    %c0_28 = arith.constant 0 : index
    %91 = vector.load %arg2[%c40, %c0_28] : memref<112x128xf32, #tpu.memory_space<vmem>>, vector<16x32xf32>
    %92 = arith.truncf %91 : vector<16x32xf32> to vector<16x32xbf16>
    %93 = arith.truncf %90 : vector<32x576xf32> to vector<32x576xbf16>
    %cst_29 = arith.constant dense<0.000000e+00> : vector<16x576xf32>
    %94 = tpu.matmul %92, %93, %cst_29 {dimension_numbers = #tpu.dot_dimension_numbers<[1], [0], [0], [1], [0, 0, 1, 1], [], []>} : vector<16x32xbf16>, vector<32x576xbf16>, vector<16x576xf32> -> vector<16x576xf32>
    %95 = arith.addf %85, %94 : vector<16x576xf32>
    %c566_i32 = arith.constant 566 : i32
    %96 = tpu.dynamic_rotate %65 by %c566_i32 dim 1 : vector<8x576xf32>, i32 -> vector<8x576xf32>
    %c564_i32 = arith.constant 564 : i32
    %97 = tpu.dynamic_rotate %65 by %c564_i32 dim 1 : vector<8x576xf32>, i32 -> vector<8x576xf32>
    %c562_i32 = arith.constant 562 : i32
    %98 = tpu.dynamic_rotate %65 by %c562_i32 dim 1 : vector<8x576xf32>, i32 -> vector<8x576xf32>
    %c560_i32_30 = arith.constant 560 : i32
    %99 = tpu.dynamic_rotate %65 by %c560_i32_30 dim 1 : vector<8x576xf32>, i32 -> vector<8x576xf32>
    %100 = tpu.concatenate %96, %97, %98, %99 in 0 : vector<8x576xf32>, vector<8x576xf32>, vector<8x576xf32>, vector<8x576xf32> -> vector<32x576xf32>
    %c56 = arith.constant 56 : index
    %c0_31 = arith.constant 0 : index
    %101 = vector.load %arg2[%c56, %c0_31] : memref<112x128xf32, #tpu.memory_space<vmem>>, vector<16x32xf32>
    %102 = arith.truncf %101 : vector<16x32xf32> to vector<16x32xbf16>
    %103 = arith.truncf %100 : vector<32x576xf32> to vector<32x576xbf16>
    %cst_32 = arith.constant dense<0.000000e+00> : vector<16x576xf32>
    %104 = tpu.matmul %102, %103, %cst_32 {dimension_numbers = #tpu.dot_dimension_numbers<[1], [0], [0], [1], [0, 0, 1, 1], [], []>} : vector<16x32xbf16>, vector<32x576xbf16>, vector<16x576xf32> -> vector<16x576xf32>
    %105 = arith.addf %95, %104 : vector<16x576xf32>
    %c0_33 = arith.constant 0 : index
    %c0_34 = arith.constant 0 : index
    %106 = vector.load %arg3[%c0_33, %c0_34] : memref<64x1xf32, #tpu.memory_space<vmem>>, vector<16x1xf32>
    %107 = vector.broadcast %106 : vector<16x1xf32> to vector<16x576xf32>
    %108 = arith.addf %105, %107 : vector<16x576xf32>
    %c88 = arith.constant 88 : index
    %c0_35 = arith.constant 0 : index
    %109 = vector.load %arg2[%c88, %c0_35] : memref<112x128xf32, #tpu.memory_space<vmem>>, vector<8x16xf32>
    %110 = arith.truncf %109 : vector<8x16xf32> to vector<8x16xbf16>
    %111 = arith.truncf %108 : vector<16x576xf32> to vector<16x576xbf16>
    %cst_36 = arith.constant dense<0.000000e+00> : vector<8x576xf32>
    %112 = tpu.matmul %110, %111, %cst_36 {dimension_numbers = #tpu.dot_dimension_numbers<[1], [0], [0], [1], [0, 0, 1, 1], [], []>} : vector<8x16xbf16>, vector<16x576xbf16>, vector<8x576xf32> -> vector<8x576xf32>
    %c40_37 = arith.constant 40 : index
    %c0_38 = arith.constant 0 : index
    %113 = vector.load %arg3[%c40_37, %c0_38] : memref<64x1xf32, #tpu.memory_space<vmem>>, vector<8x1xf32>
    %114 = vector.broadcast %113 : vector<8x1xf32> to vector<8x576xf32>
    %115 = arith.addf %112, %114 : vector<8x576xf32>
    %cst_39 = arith.constant 0.000000e+00 : f32
    %116 = vector.broadcast %cst_39 : f32 to vector<8x576xf32>
    %117 = arith.maximumf %115, %116 : vector<8x576xf32>
    %c96 = arith.constant 96 : index
    %c0_40 = arith.constant 0 : index
    %118 = vector.load %arg2[%c96, %c0_40] : memref<112x128xf32, #tpu.memory_space<vmem>>, vector<1x8xf32>
    %119 = arith.truncf %118 : vector<1x8xf32> to vector<1x8xbf16>
    %120 = arith.truncf %117 : vector<8x576xf32> to vector<8x576xbf16>
    %cst_41 = arith.constant dense<0.000000e+00> : vector<1x576xf32>
    %121 = tpu.matmul %119, %120, %cst_41 {dimension_numbers = #tpu.dot_dimension_numbers<[1], [0], [0], [1], [0, 0, 1, 1], [], []>} : vector<1x8xbf16>, vector<8x576xbf16>, vector<1x576xf32> -> vector<1x576xf32>
    %c48 = arith.constant 48 : index
    %c0_42 = arith.constant 0 : index
    %122 = vector.load %arg3[%c48, %c0_42] : memref<64x1xf32, #tpu.memory_space<vmem>>, vector<1x1xf32>
    %123 = vector.broadcast %122 : vector<1x1xf32> to vector<1x576xf32>
    %124 = arith.addf %121, %123 : vector<1x576xf32>
    %125 = arith.negf %124 : vector<1x576xf32>
    %126 = math.exp %125 : vector<1x576xf32>
    %cst_43 = arith.constant 1.000000e+00 : f32
    %127 = vector.broadcast %cst_43 : f32 to vector<1x576xf32>
    %128 = arith.addf %127, %126 : vector<1x576xf32>
    %129 = arith.divf %127, %128 : vector<1x576xf32>
    %130 = vector.broadcast %129 : vector<1x576xf32> to vector<16x576xf32>
    %131 = arith.mulf %108, %130 : vector<16x576xf32>
    %c104 = arith.constant 104 : index
    %c0_44 = arith.constant 0 : index
    %132 = vector.load %arg2[%c104, %c0_44] : memref<112x128xf32, #tpu.memory_space<vmem>>, vector<3x16xf32>
    %133 = arith.truncf %132 : vector<3x16xf32> to vector<3x16xbf16>
    %134 = arith.truncf %131 : vector<16x576xf32> to vector<16x576xbf16>
    %cst_45 = arith.constant dense<0.000000e+00> : vector<3x576xf32>
    %135 = tpu.matmul %133, %134, %cst_45 {dimension_numbers = #tpu.dot_dimension_numbers<[1], [0], [0], [1], [0, 0, 1, 1], [], []>} : vector<3x16xbf16>, vector<16x576xbf16>, vector<3x576xf32> -> vector<3x576xf32>
    %c56_46 = arith.constant 56 : index
    %c0_47 = arith.constant 0 : index
    %136 = vector.load %arg3[%c56_46, %c0_47] : memref<64x1xf32, #tpu.memory_space<vmem>>, vector<3x1xf32>
    %137 = vector.broadcast %136 : vector<3x1xf32> to vector<3x576xf32>
    %138 = arith.addf %135, %137 : vector<3x576xf32>
    %139 = vector.extract_strided_slice %138 {offsets = [0, 0], sizes = [1, 576], strides = [1, 1]} : vector<3x576xf32> to vector<1x576xf32>
    %140 = vector.extract_strided_slice %138 {offsets = [1, 0], sizes = [1, 576], strides = [1, 1]} : vector<3x576xf32> to vector<1x576xf32>
    %141 = arith.maximumf %139, %140 : vector<1x576xf32>
    %142 = vector.extract_strided_slice %138 {offsets = [2, 0], sizes = [1, 576], strides = [1, 1]} : vector<3x576xf32> to vector<1x576xf32>
    %143 = arith.maximumf %141, %142 : vector<1x576xf32>
    %144 = vector.broadcast %143 : vector<1x576xf32> to vector<3x576xf32>
    %145 = arith.subf %138, %144 : vector<3x576xf32>
    %146 = math.exp %145 : vector<3x576xf32>
    %147 = vector.extract_strided_slice %146 {offsets = [0, 0], sizes = [1, 576], strides = [1, 1]} : vector<3x576xf32> to vector<1x576xf32>
    %148 = vector.extract_strided_slice %146 {offsets = [1, 0], sizes = [1, 576], strides = [1, 1]} : vector<3x576xf32> to vector<1x576xf32>
    %149 = arith.addf %147, %148 : vector<1x576xf32>
    %150 = vector.extract_strided_slice %146 {offsets = [2, 0], sizes = [1, 576], strides = [1, 1]} : vector<3x576xf32> to vector<1x576xf32>
    %151 = arith.addf %149, %150 : vector<1x576xf32>
    %152 = tpu.reciprocal %151 {approx = true} : vector<1x576xf32> -> vector<1x576xf32>
    %153 = vector.broadcast %152 : vector<1x576xf32> to vector<3x576xf32>
    %154 = arith.mulf %146, %153 : vector<3x576xf32>
    %c1_i32_48 = arith.constant 1 : i32
    %155 = tpu.dynamic_rotate %154 by %c1_i32_48 dim 1 : vector<3x576xf32>, i32 -> vector<3x576xf32>
    %c1_i32_49 = arith.constant 1 : i32
    %156 = vector.broadcast %c1_i32_49 : i32 to vector<1x576xi32>
    %157 = arith.andi %46, %156 : vector<1x576xi32>
    %c0_i32 = arith.constant 0 : i32
    %158 = vector.broadcast %c0_i32 : i32 to vector<1x576xi32>
    %159 = arith.cmpi eq, %157, %158 : vector<1x576xi32>
    %160 = vector.shape_cast %159 : vector<1x576xi1> to vector<1x576xi1>
    %161 = vector.broadcast %160 : vector<1x576xi1> to vector<3x576xi1>
    %162 = arith.select %161, %154, %155 : vector<3x576xi1>, vector<3x576xf32>
    %c0_50 = arith.constant 0 : index
    %c0_51 = arith.constant 0 : index
    %c0_52 = arith.constant 0 : index
    %163 = vector.load %arg4[%c0_50, %c0_51, %c0_52] : memref<1x3x576xf32, #tpu.memory_space<vmem>>, vector<1x3x576xf32>
    %164 = vector.shape_cast %163 : vector<1x3x576xf32> to vector<3x576xf32>
    %165 = vector.shape_cast %162 : vector<3x576xf32> to vector<1x3x576xf32>
    tpu.vector_store %arg4[%c0_50, %c0_51, %c0_52], %165 {strides = array<i32>} : memref<1x3x576xf32, #tpu.memory_space<vmem>>, vector<1x3x576xf32>,
    return
  }
  func.func @transform_0(%arg0: i32) -> (i32, i32, i32) {
    %c0_i32 = arith.constant 0 : i32
    %c0_i32_0 = arith.constant 0 : i32
    %c0_i32_1 = arith.constant 0 : i32
    return %arg0, %c0_i32, %c0_i32_0 : i32, i32, i32
  }
  func.func @transform_1(%arg0: i32) -> (i32, i32) {
    %c0_i32 = arith.constant 0 : i32
    %c0_i32_0 = arith.constant 0 : i32
    %c0_i32_1 = arith.constant 0 : i32
    return %c0_i32, %c0_i32_0 : i32, i32
  }
  func.func @transform_2(%arg0: i32) -> (i32, i32) {
    %c0_i32 = arith.constant 0 : i32
    %c0_i32_0 = arith.constant 0 : i32
    %c0_i32_1 = arith.constant 0 : i32
    return %c0_i32, %c0_i32_0 : i32, i32
  }
  func.func @transform_3(%arg0: i32) -> (i32, i32, i32) {
    %c0_i32 = arith.constant 0 : i32
    %c0_i32_0 = arith.constant 0 : i32
    %c0_i32_1 = arith.constant 0 : i32
    return %arg0, %c0_i32, %c0_i32_0 : i32, i32, i32
  }
}

</mosaic_0001>

<bundles_post_ra>
// kernel: tpu_custom_call.1
= control target key start
LH: loop header
LB: loop body
LE: loop exit
PB: predicated region body
PF: predicated region fallthrough
CT: control target
= control target key end

     0   :  { %8 = vsyncpa [#allocation3], 0  ;;  %s2991_s12 = smov 0   ;;  %s4115_s0 = inlined_call_operand.vmem [shape: f32[2,1,576], index: 0, kind: input, shape index: {}]   ;;  %s4116_s1 = inlined_call_operand.hbm [shape: f32[112,128], index: 1, kind: input, shape index: {}]   ;;  %s4117_s2 = inlined_call_operand.vmem [shape: f32[64,1], index: 2, kind: input, shape index: {}]   ;;  %s4118_s3 = inlined_call_operand.vmem [shape: f32[2,3,576], index: 3, kind: output, shape index: {}]  }
   0x1 LB: > { %s124_s15 = sshll.u32 %s4116_s1, 4  ;;  %s2484_s16 = sadd.s32 4294967295, %s2943_s12   ;;  %s2943_s12 = sphi %s2991_s12, %s14_s12   ;;  %s125_s15 = int_to_ptr.hbm [resolvable:$true] %s124_s15 }
   0x2   : > { %p2486_p0 = scmp.ge.s32.totalorder %s2943_s12, 1  ;;  %p113_p1 = scmp.lt.s32.totalorder %s2943_s12, 3 }
   0x3   : > { %p2564_p2 = scmp.eq.s32.totalorder %s2484_s16, 0  ;;  %s2945_s17 = smov [#allocation2]  }
   0x4   : > { %p114_p3 = pnand %p2486_p0, %p113_p1  ;;  %s126_s18 = sshll.u32 %s2945_s17, 4  ;;  %s127_s18 = int_to_ptr.vmem [resolvable:$true] %s126_s18 }
   0x5   : > { %s2946_s19 = smov 128   ;;  %s2947_s20 = smov 8  }
   0x6   : > { %p2560_p4 = pneg %p114_p3  ;;  %152 = sbr.rel (%p114_p3) target bundleno = 2635 (0xa4b), region = 32 }
   0x8   : > { %p2561_p5 = pnand %p2564_p2, %p2560_p4 }
   0xa   : > { %2563 = dma.hbm_to_vmem [thread:$0]  (!%p2561_p5), %s125_s15, 1792, %s127_s18, [#allocation3], %s2946_s19, %s2946_s19, %s2947_s20  }
   0xb   : > { %2938 = dma.done.wait (%p2564_p2), [#allocation3], 1792  }
   0xc   : > { %2940 = vsyncadd (%p2564_p2), [#allocation3], 4294965504  ;;  %p176_p6 = scmp.lt.s32.totalorder %s2484_s16, 1  ;;  %s2948_s25 = smov 64   ;;  %vm4119_vm0 = vcmask 1048064   ;;  %vm578_vm1 = vcmask 1040384  }
   0xd   : > { %s2949_s26 = smov 56   ;;  %s2950_s27 = smov 55   ;;  %vm584_vm2 = vcmask 1041408   ;;  %vm495_vm3 = vcmask 424960   ;;  %vm590_vm4 = vcmask 1042432   ;;  %vm596_vm5 = vcmask 1043456  }
   0xe   : > { %s4156_s16 = smov (!%p176_p6, %s2484_s16), 1  ;;  %s2951_s28 = smov 53   ;;  %vm399_vm6 = vcmask 457728   ;;  %vm423_vm7 = vcmask 449536   ;;  %vm447_vm8 = vcmask 441344   ;;  %vm471_vm9 = vcmask 433152  }
   0xf   : > { %s2554_s21 = smul.u32 5, %s4156_s16  ;;  %s2952_s29 = smov 54   ;;  %vm4122_vm10 = vcmask 416768   ;;  %vm602_vm11 = vcmask 1044480   ;;  %vm4121_vm12 = vcmask 408576   ;;  %vm608_vm13 = vcmask 1045504  }
  0x10   : > { %s2953_s30 = smov 52   ;;  %s2954_s4 = smov 50   ;;  %vm4120_vm14 = vcmask 400384   ;;  %vm614_vm15 = vcmask 1046528  }
  0x11   : > { %s179_s24 = scalar_lea.vmem %s4115_s0, %s2554_s21  ;;  %s2955_s5 = smov 51  }
  0x12   : > { %v3008_v0 = vld [vmem:[%s179_s24] sm:$0x1f]  ;;  %s2956_s6 = smov 49   ;;  %s2957_s7 = smov 57  }
  0x13   : > { %v3011_v1 = vperm.slane %v3008_v0, 0  ;;  %v3014_v2 = vperm.slane %v3008_v0, 1  ;;  %v3025_v6 = vperm.slane %v3008_v0, 2  ;;  %v3028_v7 = vperm.slane %v3008_v0, 3  ;;  %s2958_s8 = smov 126   ;;  %s2959_s9 = smov 127  }
  0x14   : > { %v192_v45 = vperm.slane %v3008_v0, 4  ;;  %s2960_s10 = smov 124   ;;  %s2961_s11 = smov 125  }
  0x15   : > { %v3018_v3 = vpack.i.bf16 %v3014_v2, %v3011_v1  ;;  %v409_v4 = vrot.slane %v3011_v1, 7  ;;  %v410_v5 = vrot.slane %v3014_v2, 7  ;;  %v411_v9 = vrot.slane %v3025_v6, 7  ;;  %s2962_s13 = smov 123   ;;  %s2963_s14 = smov 122  }
  0x16   : > { %v412_v10 = vrot.slane %v3028_v7, 7  ;;  %v459_v11 = vrot.slane %v3025_v6, 5  ;;  %v460_v12 = vrot.slane %v3028_v7, 5  ;;  %v2605_v13 = vpack.i.bf16 %v3028_v7, %v3025_v6  ;;  %s2964_s15 = smov 71   ;;  %s2966_s23 = smov 58  }
  0x17   : > { %2601 = vrot.lane.b32.xlu0 %v3018_v3, %s2948_s25  ;;  %v2620_v8 = vpack.i.bf16 %v410_v5, %v409_v4  ;;  %2611 = vrot.lane.b32.xlu2 %v3018_v3, %s2949_s26  ;;  %v433_v16 = vrot.slane %v3011_v1, 6  ;;  %v434_v17 = vrot.slane %v3014_v2, 6  ;;  %v481_v18 = vrot.slane %v3011_v1, 4  ;;  %s2967_s24 = smov 70  }
  0x18   : > { %v2625_v14 = vpack.i.bf16 %v412_v10, %v411_v9  ;;  %v2645_v15 = vpack.i.bf16 %v460_v12, %v459_v11  ;;  %v482_v19 = vrot.slane %v3014_v2, 4  ;;  %v435_v22 = vrot.slane %v3025_v6, 6 }
  0x19   : > { %2621 = vrot.lane.b32.xlu1 %v2620_v8, %s2950_s27  ;;  %v2630_v20 = vpack.i.bf16 %v434_v17, %v433_v16  ;;  %v436_v23 = vrot.slane %v3028_v7, 6  ;;  %v483_v24 = vrot.slane %v3025_v6, 4  ;;  %v484_v25 = vrot.slane %v3028_v7, 4 }
  0x1a   : > { %v2650_v21 = vpack.i.bf16 %v482_v19, %v481_v18  ;;  %v531_v28 = vrot.slane %v3025_v6, 2  ;;  %v457_v29 = vrot.slane %v3011_v1, 5  ;;  %v458_v30 = vrot.slane %v3014_v2, 5 }
  0x1b   : > { %v2635_v26 = vpack.i.bf16 %v436_v23, %v435_v22  ;;  %v2655_v27 = vpack.i.bf16 %v484_v25, %v483_v24  ;;  %v505_v31 = vrot.slane %v3011_v1, 3  ;;  %v506_v32 = vrot.slane %v3014_v2, 3 }
  0x1c   : > { %v553_v33 = vrot.slane %v3011_v1, 1  ;;  %v554_v34 = vrot.slane %v3014_v2, 1  ;;  %v2640_v35 = vpack.i.bf16 %v458_v30, %v457_v29  ;;  %v507_v38 = vrot.slane %v3025_v6, 3 }
  0x1d   : > { %v2660_v36 = vpack.i.bf16 %v506_v32, %v505_v31  ;;  %v508_v39 = vrot.slane %v3028_v7, 3  ;;  %v529_v41 = vrot.slane %v3011_v1, 2  ;;  %v530_v42 = vrot.slane %v3014_v2, 2 }
  0x1e   : > { %v2680_v37 = vpack.i.bf16 %v554_v34, %v553_v33  ;;  %v555_v44 = vrot.slane %v3025_v6, 1  ;;  %v532_v31 = vrot.slane %v3028_v7, 2 }
  0x1f   : > { %2606 = vrot.lane.b32.xlu0 %v2605_v13, %s2948_s25  ;;  %2626 = vrot.lane.b32.xlu2 %v2625_v14, %s2950_s27  ;;  %v2665_v40 = vpack.i.bf16 %v508_v39, %v507_v38  ;;  %v2670_v43 = vpack.i.bf16 %v530_v42, %v529_v41 }
  0x21   : > { %2646 = vrot.lane.b32.xlu1 %v2645_v15, %s2951_s28 }
  0x27   : > { %2616 = vrot.lane.b32.xlu0 %v2605_v13, %s2949_s26  ;;  %2631 = vrot.lane.b32.xlu2 %v2630_v20, %s2952_s29 }
  0x29   : > { %2651 = vrot.lane.b32.xlu1 %v2650_v21, %s2953_s30 }
  0x2f   : > { %2636 = vrot.lane.b32.xlu0 %v2635_v26, %s2952_s29  ;;  %2656 = vrot.lane.b32.xlu2 %v2655_v27, %s2953_s30 }
  0x31   : > { %537 = vrot.lane.b32.xlu1 %v531_v28, %s2954_s4 }
  0x37   : > { %2641 = vrot.lane.b32.xlu0 %v2640_v35, %s2951_s28  ;;  %2661 = vrot.lane.b32.xlu2 %v2660_v36, %s2955_s5 }
  0x39   : > { %2681 = vrot.lane.b32.xlu1 %v2680_v37, %s2956_s6 }
  0x3f   : > { %2666 = vrot.lane.b32.xlu0 %v2665_v40, %s2955_s5  ;;  %2676 = vrot.lane.b32.xlu2 %v3018_v3, %s2957_s7 }
  0x47   : > { %2671 = vrot.lane.b32.xlu0 %v2670_v43, %s2954_s4  ;;  %562 = vrot.lane.b32.xlu2 %v555_v44, %s2956_s6 }
  0x4f   : > { %373 = vrot.lane.b32.xlu0 %v3025_v6, %s2957_s7 }
  0x71   : > { %v3093_v54 = vpop.permute.xlu2 %2611 }
  0x72   : > { %v2613_v15 = vunpack.i.l.bf16 %v3093_v54 }
  0x79   : > { %v3114_v3 = vpop.permute.xlu2 %2626 }
  0x81   : > { %v3136_v17 = vpop.permute.xlu2 %2631 }
  0x82   : > { %v2633_v35 = vunpack.i.l.bf16 %v3136_v17 }
  0x89   : > { %v2602_v46 = vpop.permute.xlu0 %2601  ;;  %v3159_v33 = vpop.permute.xlu2 %2656 }
  0x8a   : > { %v2603_v47 = vunpack.i.l.bf16 %v2602_v46  ;;  %v2604_v49 = vunpack.i.h.bf16 %v2602_v46  ;;  %v4127_v36 = vunpack.i.h.bf16 %v3159_v33  ;;  %v2658_v37 = vunpack.i.l.bf16 %v3159_v33 }
  0x8b   : > { %v3134_v16 = vpop.permute.xlu1 %2621 }
  0x8c   : > { %v3082_v48 = vsel %vm4119_vm0, %v2603_v47, %v192_v45  ;;  %v3087_v50 = vsel %vm4119_vm0, %v2604_v49, %v2603_v47  ;;  %v2623_v20 = vunpack.i.l.bf16 %v3134_v16  ;;  %v3169_v39 = vsel %vm495_vm3, %v2658_v37, %v4127_v36 }
  0x8d   : > { %208 = vrot.lane.b32.xlu1 %v3082_v48, %s2948_s25  ;;  %v245_v57 = vrot.slane %v3087_v50, 6  ;;  %v219_v58 = vrot.slane %v3082_v48, 7  ;;  %v220_v61 = vrot.slane %v3087_v50, 7  ;;  %v294_v9 = vrot.slane %v3082_v48, 4 }
  0x8e   : > { %v269_v10 = vrot.slane %v3082_v48, 5  ;;  %v244_v11 = vrot.slane %v3082_v48, 6  ;;  %v320_v23 = vrot.slane %v3087_v50, 3  ;;  %v295_v24 = vrot.slane %v3087_v50, 4 }
  0x8f   : > { %v620_v25 = vsel %vm578_vm1, %v2613_v15, %v2623_v20  ;;  %v270_v26 = vrot.slane %v3087_v50, 5  ;;  %v344_v30 = vrot.slane %v3082_v48, 2  ;;  %v319_v41 = vrot.slane %v3082_v48, 3 }
  0x90   : > { %v625_v46 = vsel %vm584_vm2, %v620_v25, %v2633_v35 }
  0x91   : > { %v3089_v51 = vpop.permute.xlu0 %2606  ;;  %v2745_v43 = vpack.i.bf16 %v344_v30, %v532_v31  ;;  %v2629_v31 = vunpack.i.h.bf16 %v3114_v3 }
  0x92   : > { %v2609_v52 = vunpack.i.h.bf16 %v3089_v51  ;;  %v2608_v53 = vunpack.i.l.bf16 %v3089_v51 }
  0x93   : > { %v3157_v32 = vpop.permute.xlu1 %2646 }
  0x94   : > { %v3096_v55 = vsel %vm4119_vm0, %v2608_v53, %v2604_v49  ;;  %v3101_v56 = vsel %vm4119_vm0, %v2609_v52, %v2608_v53  ;;  %v2614_v49 = vunpack.i.h.bf16 %v3093_v54 }
  0x95   : > { %v246_v59 = vrot.slane %v3096_v55, 6  ;;  %v222_v60 = vrot.slane %v3101_v56, 7  ;;  %v221_v62 = vrot.slane %v3096_v55, 7  ;;  %v297_v5 = vrot.slane %v3101_v56, 4 }
  0x96   : > { %v272_v6 = vrot.slane %v3101_v56, 5  ;;  %v247_v8 = vrot.slane %v3101_v56, 6  ;;  %v321_v18 = vrot.slane %v3096_v55, 3  ;;  %v296_v19 = vrot.slane %v3096_v55, 4 }
  0x97   : > { %v2695_v63 = vpack.i.bf16 %v246_v59, %v245_v57  ;;  %v2690_v1 = vpack.i.bf16 %v219_v58, %v222_v60  ;;  %v2685_v2 = vpack.i.bf16 %v221_v62, %v220_v61  ;;  %v2720_v12 = vpack.i.bf16 %v294_v9, %v297_v5 }
  0x98   : > { %v2710_v13 = vpack.i.bf16 %v269_v10, %v272_v6  ;;  %v2700_v14 = vpack.i.bf16 %v244_v11, %v247_v8  ;;  %v271_v22 = vrot.slane %v3096_v55, 5  ;;  %v2725_v27 = vpack.i.bf16 %v321_v18, %v320_v23 }
  0x99   : > { %2696 = vrot.lane.b32.xlu0 %v2695_v63, %s2958_s8  ;;  %2691 = vrot.lane.b32.xlu2 %v2690_v1, %s2959_s9  ;;  %v3116_v4 = vpop.permute.xlu0 %2616  ;;  %v2715_v28 = vpack.i.bf16 %v296_v19, %v295_v24  ;;  %v347_v34 = vrot.slane %v3101_v56, 2  ;;  %v322_v38 = vrot.slane %v3101_v56, 3  ;;  %v346_v53 = vrot.slane %v3096_v55, 2 }
  0x9a   : > { %2686 = vrot.lane.b32.xlu1 %v2685_v2, %s2959_s9  ;;  %v2705_v29 = vpack.i.bf16 %v271_v22, %v270_v26  ;;  %v2618_v57 = vunpack.i.l.bf16 %v3116_v4  ;;  %v2628_v59 = vunpack.i.l.bf16 %v3114_v3  ;;  %v2624_v60 = vunpack.i.h.bf16 %v3134_v16 }
  0x9b   : > { %v2740_v44 = vpack.i.bf16 %v344_v30, %v347_v34  ;;  %v2730_v47 = vpack.i.bf16 %v319_v41, %v322_v38  ;;  %v2652_v62 = vpop.permute.xlu1 %2651  ;;  %v2634_v63 = vunpack.i.h.bf16 %v3136_v17  ;;  %v2648_v2 = vunpack.i.l.bf16 %v3157_v32 }
  0x9c   : > { %v2653_v5 = vunpack.i.l.bf16 %v2652_v62  ;;  %v2654_v8 = vunpack.i.h.bf16 %v2652_v62  ;;  %v425_v17 = vsel %vm423_vm7, %v2624_v60, %v2628_v59 }
  0x9d   : > { %v448_v30 = vsel %vm447_vm8, %v2633_v35, %v2634_v63 }
  0x9e   : > { %v497_v22 = vsel %vm495_vm3, %v2654_v8, %v2658_v37  ;;  %v2649_v37 = vunpack.i.h.bf16 %v3157_v32 }
  0xa1   : > { %2721 = vrot.lane.b32.xlu0 %v2720_v12, %s2960_s10  ;;  %2711 = vrot.lane.b32.xlu2 %v2710_v13, %s2961_s11  ;;  %v3141_v21 = vpop.permute.xlu0 %2636  ;;  %v401_v13 = vsel %vm399_vm6, %v2614_v49, %v2618_v57 }
  0xa2   : > { %2701 = vrot.lane.b32.xlu1 %v2700_v14, %s2958_s8  ;;  %v2638_v1 = vunpack.i.l.bf16 %v3141_v21  ;;  %v345_v14 = vrot.slane %v3087_v50, 2  ;;  %v622_v24 = vsel %vm578_vm1, %v401_v13, %v425_v17 }
  0xa3   : > { %v3274_v62 = vpop.permute.xlu1 %537 }
  0xa4   : > { %v449_v18 = vsel %vm447_vm8, %v2634_v63, %v2638_v1  ;;  %v2735_v19 = vpack.i.bf16 %v346_v53, %v345_v14 }
  0xa5   : > { %v627_v25 = vsel %vm584_vm2, %v622_v24, %v449_v18 }
  0xa9   : > { %2726 = vrot.lane.b32.xlu0 %v2725_v27, %s2962_s13  ;;  %2716 = vrot.lane.b32.xlu2 %v2715_v28, %s2960_s10  ;;  %v2642_v40 = vpop.permute.xlu0 %2641  ;;  %v424_v28 = vsel %vm423_vm7, %v2623_v20, %v2624_v60  ;;  %v556_v20 = vrot.slane %v3028_v7, 1 }
  0xaa   : > { %2706 = vrot.lane.b32.xlu1 %v2705_v29, %s2961_s11  ;;  %v2643_v42 = vunpack.i.l.bf16 %v2642_v40  ;;  %v2644_v6 = vunpack.i.h.bf16 %v2642_v40  ;;  %v496_v29 = vsel %vm495_vm3, %v2653_v5, %v2654_v8 }
  0xac   : > { %v630_v61 = vsel %vm590_vm4, %v625_v46, %v2643_v42  ;;  %v473_v23 = vsel %vm471_vm9, %v2644_v6, %v2648_v2  ;;  %v472_v34 = vsel %vm471_vm9, %v2643_v42, %v2644_v6  ;;  %v426_v42 = vsel %vm423_vm7, %v2628_v59, %v2629_v31  ;;  %v3268_v59 = vpop.permute.xlu2 %2661 }
  0xad   : > { %v3188_v12 = vsel %vm596_vm5, %v630_v61, %v2653_v5  ;;  %v632_v26 = vsel %vm590_vm4, %v627_v25, %v473_v23  ;;  %v2664_v24 = vunpack.i.h.bf16 %v3268_v59  ;;  %v2663_v25 = vunpack.i.l.bf16 %v3268_v59 }
  0xae   : > { %v3206_v27 = vsel %vm596_vm5, %v632_v26, %v497_v22 }
  0xb1   : > { %2746 = vrot.lane.b32.xlu0 %v2745_v43, %s2954_s4  ;;  %2741 = vrot.lane.b32.xlu2 %v2740_v44, %s2963_s14  ;;  %v3236_v38 = vpop.permute.xlu0 %2666 }
  0xb2   : > { %2731 = vrot.lane.b32.xlu1 %v2730_v47, %s2962_s13  ;;  %v4124_v40 = vunpack.i.h.bf16 %v3236_v38  ;;  %v2668_v44 = vunpack.i.l.bf16 %v3236_v38  ;;  %v474_v47 = vsel %vm471_vm9, %v2648_v2, %v2649_v37 }
  0xb4   : > { %v3270_v60 = vpop.permute.xlu2 %2676 }
  0xb9   : > { %421 = vrot.lane.b32.xlu0 %v219_v58, %s2950_s27  ;;  %397 = vrot.lane.b32.xlu2 %v3082_v48, %s2949_s26  ;;  %v400_v58 = vsel %vm399_vm6, %v2613_v15, %v2614_v49  ;;  %v2639_v15 = vunpack.i.h.bf16 %v3141_v21  ;;  %v2679_v21 = vunpack.i.h.bf16 %v3270_v60  ;;  %s2968_s26 = smov 78   ;;  %s2969_s27 = smov 118  }
  0xba   : > { %2736 = vrot.lane.b32.xlu1 %v2735_v19, %s2963_s14 }
  0xbc   : > { %v3272_v61 = vpop.permute.xlu2 %562 }
  0xc1   : > { %469 = vrot.lane.b32.xlu0 %v269_v10, %s2951_s28  ;;  %445 = vrot.lane.b32.xlu2 %v244_v11, %s2952_s29  ;;  %v621_v10 = vsel %vm578_vm1, %v400_v58, %v424_v28  ;;  %v2619_v11 = vunpack.i.h.bf16 %v3116_v4 }
  0xc2   : > { %375 = vrot.lane.b32.xlu1 %v3028_v7, %s2957_s7  ;;  %v626_v54 = vsel %vm584_vm2, %v621_v10, %v448_v30  ;;  %v450_v7 = vsel %vm447_vm8, %v2638_v1, %v2639_v15  ;;  %v3278_v1 = vpop.permute.xlu1 %2681 }
  0xc3   : > { %v631_v16 = vsel %vm590_vm4, %v626_v54, %v472_v34  ;;  %v402_v4 = vsel %vm399_vm6, %v2618_v57, %v2619_v11  ;;  %v521_v34 = vsel %vm4122_vm10, %v2664_v24, %v2668_v44  ;;  %v520_v54 = vsel %vm4122_vm10, %v2663_v25, %v2664_v24 }
  0xc4   : > { %v3234_v35 = vsel %vm596_vm5, %v631_v16, %v496_v29  ;;  %v623_v43 = vsel %vm578_vm1, %v402_v4, %v426_v42  ;;  %v2684_v0 = vunpack.i.h.bf16 %v3278_v1 }
  0xc5   : > { %v628_v46 = vsel %vm584_vm2, %v623_v43, %v450_v7  ;;  %v641_v4 = vsel %vm602_vm11, %v3234_v35, %v520_v54 }
  0xc6   : > { %v633_v49 = vsel %vm590_vm4, %v628_v46, %v474_v47  ;;  %v570_v46 = vsel %vm4120_vm14, %v2684_v0, %v3272_v61 }
  0xc7   : > { %v638_v53 = vsel %vm596_vm5, %v633_v49, %v3169_v39  ;;  %v3280_v39 = vpop.permute.xlu0 %2671 }
  0xc8   : > { %v2674_v30 = vunpack.i.h.bf16 %v3280_v39  ;;  %v2673_v10 = vunpack.i.l.bf16 %v3280_v39 }
  0xc9   : > { %517 = vrot.lane.b32.xlu2 %v319_v41, %s2955_s5  ;;  %v522_v41 = vsel %vm4122_vm10, %v2668_v44, %v4124_v40  ;;  %vm334_vm10 = vcmask 1006592  }
  0xca   : > { %564 = vrot.lane.b32.xlu1 %v556_v20, %s2956_s6  ;;  %v3263_v57 = vsel %vm602_vm11, %v638_v53, %v522_v41  ;;  %v545_v16 = vsel %vm4121_vm12, %v2674_v30, %v3274_v62  ;;  %v642_v20 = vsel %vm602_vm11, %v3206_v27, %v521_v34 }
  0xcb   : > { %v647_v47 = vsel %vm608_vm13, %v642_v20, %v545_v16 }
  0xcc   : > { %v3355_v53 = vsel %vm614_vm15, %v647_v47, %v570_v46 }
  0xcf   : > { %v3289_v6 = vpop.permute.xlu0 %373 }
  0xd2   : > { %493 = vrot.lane.b32.xlu1 %v294_v9, %s2953_s30 }
  0xf3   : > { %v3276_v63 = vpop.permute.xlu2 %2691 }
  0xf4   : > { %v4123_v34 = vunpack.i.l.bf16 %v3276_v63 }
  0xfb   : > { %v3282_v2 = vpop.permute.xlu2 %2711 }
  0xff   : > { %v209_v5 = vpop.permute.xlu1 %208 }
 0x100   : > { %v3287_v9 = vsel %vm4119_vm0, %v209_v5, %v2609_v52  ;;  %vm309_vm0 = vcmask 1014784  }
 0x101   : > { %v273_v8 = vrot.slane %v3287_v9, 5  ;;  %v248_v13 = vrot.slane %v3287_v9, 6  ;;  %v223_v14 = vrot.slane %v3287_v9, 7  ;;  %v348_v51 = vrot.slane %v3287_v9, 2 }
 0x102   : > { %v323_v52 = vrot.slane %v3287_v9, 3  ;;  %v298_v18 = vrot.slane %v3287_v9, 4 }
 0x103   : > { %v3294_v17 = vpop.permute.xlu2 %2716  ;;  %282 = vrot.lane.b32.xlu2 %v273_v8, %s2961_s11  ;;  %257 = vrot.lane.b32.xlu1 %v248_v13, %s2958_s8  ;;  %s2970_s11 = smov 65  }
 0x104   : > { %232 = vrot.lane.b32.xlu0 %v223_v14, %s2959_s9 }
 0x10b   : > { %v3302_v19 = vpop.permute.xlu0 %2696  ;;  %v3304_v22 = vpop.permute.xlu2 %2741  ;;  %357 = vrot.lane.b32.xlu2 %v348_v51, %s2963_s14  ;;  %332 = vrot.lane.b32.xlu1 %v323_v52, %s2962_s13 }
 0x10c   : > { %307 = vrot.lane.b32.xlu0 %v298_v18, %s2960_s10  ;;  %v2687_v23 = vpop.permute.xlu1 %2686  ;;  %v2699_v8 = vunpack.i.h.bf16 %v3302_v19  ;;  %v2698_v13 = vunpack.i.l.bf16 %v3302_v19  ;;  %v2719_v18 = vunpack.i.h.bf16 %v3294_v17  ;;  %v2744_v47 = vunpack.i.h.bf16 %v3304_v22 }
 0x10d   : > { %v2689_v49 = vunpack.i.h.bf16 %v2687_v23  ;;  %v2688_v41 = vunpack.i.l.bf16 %v2687_v23  ;;  %v2718_v23 = vunpack.i.l.bf16 %v3294_v17  ;;  %v2713_v17 = vunpack.i.l.bf16 %v3282_v2 }
 0x10f   : > { %v311_v46 = vsel %vm309_vm0, %v2718_v23, %v2719_v18 }
 0x113   : > { %v3311_v26 = vpop.permute.xlu0 %2721  ;;  %v398_v58 = vpop.permute.xlu2 %397  ;;  %377 = vrot.lane.b32.xlu2 %v192_v45, %s2957_s7  ;;  %v2683_v45 = vunpack.i.l.bf16 %v3278_v1 }
 0x114   : > { %v3317_v28 = vsel %vm399_vm6, %v2619_v11, %v398_v58  ;;  %v3319_v29 = vpop.permute.xlu1 %2701  ;;  %v544_v11 = vsel %vm4121_vm12, %v2673_v10, %v2674_v30  ;;  %vm4125_vm6 = vcmask 1039360   ;;  %vm284_vm12 = vcmask 1022976  }
 0x115   : > { %v569_v27 = vsel %vm4120_vm14, %v2683_v45, %v2684_v0  ;;  %v646_v35 = vsel %vm608_vm13, %v641_v4, %v544_v11  ;;  %vm259_vm14 = vcmask 1031168   ;;  %v236_v14 = vsel %vm4125_vm6, %v2688_v41, %v2689_v49 }
 0x116   : > { %v3358_v5 = vsel %vm614_vm15, %v646_v35, %v569_v27  ;;  %v4126_v24 = vunpack.i.l.bf16 %v3319_v29  ;;  %v2694_v30 = vunpack.i.h.bf16 %v3276_v63  ;;  %v2714_v0 = vunpack.i.h.bf16 %v3282_v2 }
 0x117   : > { %v261_v11 = vsel %vm259_vm14, %v2698_v13, %v2699_v8  ;;  %v580_v16 = vsel %vm578_vm1, %v3087_v50, %v236_v14  ;;  %v237_v20 = vsel %vm4125_vm6, %v2689_v49, %v4123_v34  ;;  %v2723_v27 = vunpack.i.l.bf16 %v3311_v26 }
 0x118   : > { %v235_v4 = vsel %vm4125_vm6, %v2694_v30, %v2688_v41  ;;  %v262_v50 = vsel %vm259_vm14, %v2699_v8, %v4126_v24  ;;  %v2743_v35 = vunpack.i.l.bf16 %v3304_v22  ;;  %v586_v41 = vsel %vm584_vm2, %v580_v16, %v261_v11  ;;  %v662_v22 = vld [vmem:[%s4117_s2 + $0x10] sm:$0xff] }
 0x119   : > { %v581_v30 = vsel %vm578_vm1, %v3096_v55, %v237_v20  ;;  %v579_v34 = vsel %vm578_vm1, %v3082_v48, %v235_v4  ;;  %vm359_vm6 = vcmask 998400   ;;  %v2724_v11 = vunpack.i.h.bf16 %v3311_v26 }
 0x11a   : > { %v587_v24 = vsel %vm584_vm2, %v581_v30, %v262_v50  ;;  %v312_v55 = vsel %vm309_vm0, %v2719_v18, %v2723_v27 }
 0x11b   : > { %v3338_v42 = vpop.permute.xlu0 %2726  ;;  %v446_v7 = vpop.permute.xlu2 %445 }
 0x11c   : > { %v3343_v43 = vsel %vm447_vm8, %v2639_v15, %v446_v7  ;;  %v2707_v44 = vpop.permute.xlu1 %2706  ;;  %v2678_v15 = vunpack.i.l.bf16 %v3270_v60  ;;  %vm379_vm8 = vcmask 465920   ;;  %v2704_v7 = vunpack.i.h.bf16 %v3319_v29 }
 0x11d   : > { %v2709_v51 = vunpack.i.h.bf16 %v2707_v44  ;;  %v2708_v52 = vunpack.i.l.bf16 %v2707_v44  ;;  %v381_v19 = vsel %vm379_vm8, %v2679_v21, %v3289_v6  ;;  %v2729_v36 = vunpack.i.h.bf16 %v3338_v42 }
 0x11e   : > { %v260_v8 = vsel %vm259_vm14, %v2704_v7, %v2698_v13 }
 0x11f   : > { %v286_v44 = vsel %vm284_vm12, %v2708_v52, %v2709_v51  ;;  %v287_v49 = vsel %vm284_vm12, %v2709_v51, %v2713_v17  ;;  %v2728_v51 = vunpack.i.l.bf16 %v3338_v42  ;;  %v285_v16 = vsel %vm284_vm12, %v2714_v0, %v2708_v52 }
 0x120   : > { %v592_v40 = vsel %vm590_vm4, %v586_v41, %v286_v44  ;;  %v593_v20 = vsel %vm590_vm4, %v587_v24, %v287_v49  ;;  %v585_v18 = vsel %vm584_vm2, %v579_v34, %v260_v8 }
 0x121   : > { %v598_v44 = vsel %vm596_vm5, %v592_v40, %v311_v46  ;;  %v336_v40 = vsel %vm334_vm10, %v2728_v51, %v2729_v36  ;;  %v591_v46 = vsel %vm590_vm4, %v585_v18, %v285_v16  ;;  %v599_v49 = vsel %vm596_vm5, %v593_v20, %v312_v55 }
 0x122   : > { %v310_v55 = vsel %vm309_vm0, %v2724_v11, %v2718_v23 }
 0x123   : > { %v3366_v58 = vpop.permute.xlu0 %2746  ;;  %v518_v60 = vpop.permute.xlu2 %517 }
 0x124   : > { %v3374_v54 = vpop.permute.xlu1 %2731  ;;  %v2749_v39 = vunpack.i.h.bf16 %v3366_v58 }
 0x125   : > { %v2733_v14 = vunpack.i.l.bf16 %v3374_v54  ;;  %v2734_v13 = vunpack.i.h.bf16 %v3374_v54 }
 0x127   : > { %v337_v7 = vsel %vm334_vm10, %v2729_v36, %v2733_v14  ;;  %v335_v30 = vsel %vm334_vm10, %v2734_v13, %v2728_v51  ;;  %v597_v51 = vsel %vm596_vm5, %v591_v46, %v310_v55  ;;  %v4132_v46 = vunpack.i.l.bf16 %v3276_v63  ;;  %v655_v55 = vld [vmem:[#allocation2] sm:$0xff] }
 0x128   : > { %v605_v3 = vsel %vm602_vm11, %v599_v49, %v337_v7  ;;  %v603_v7 = vsel %vm602_vm11, %v597_v51, %v335_v30 }
 0x12b   : > { %v422_v4 = vpop.permute.xlu0 %421 }
 0x12c   : > { %v427_v42 = vsel %vm423_vm7, %v2629_v31, %v422_v4  ;;  %v2737_v50 = vpop.permute.xlu1 %2736  ;;  %vm4130_vm7 = vcmask 416768  }
 0x12d   : > { %v624_v52 = vsel %vm578_vm1, %v3317_v28, %v427_v42  ;;  %v2739_v24 = vunpack.i.h.bf16 %v2737_v50  ;;  %v2738_v0 = vunpack.i.l.bf16 %v2737_v50  ;;  %v604_v28 = vsel %vm602_vm11, %v598_v44, %v336_v40 }
 0x12e   : > { %v629_v41 = vsel %vm584_vm2, %v624_v52, %v3343_v43  ;;  %v380_v43 = vsel %vm379_vm8, %v2678_v15, %v2679_v21  ;;  %v640_v21 = vsel %vm602_vm11, %v3188_v12, %v2663_v25 }
 0x12f   : > { %v362_v31 = vsel %vm359_vm6, %v2739_v24, %v2743_v35  ;;  %v361_v34 = vsel %vm359_vm6, %v2738_v0, %v2739_v24  ;;  %v360_v16 = vsel %vm359_vm6, %v2744_v47, %v2738_v0  ;;  %v645_v12 = vsel %vm608_vm13, %v640_v21, %v2673_v10 }
 0x130   : > { %v611_v36 = vsel %vm608_vm13, %v605_v3, %v362_v31  ;;  %v610_v8 = vsel %vm608_vm13, %v604_v28, %v361_v34  ;;  %v2748_v10 = vunpack.i.l.bf16 %v3366_v58 }
 0x131   : > { %v617_v20 = vsel %vm614_vm15, %v611_v36, %v381_v19  ;;  %v616_v4 = vsel %vm614_vm15, %v610_v8, %v380_v43 }
 0x132   : > { %v659_v44 = vpack.c.bf16 %v3355_v53, %v617_v20  ;;  %v658_v13 = vpack.c.bf16 %v3358_v5, %v616_v4  ;;  %v609_v53 = vsel %vm608_vm13, %v603_v7, %v360_v16  ;;  %v557_v5 = vrot.slane %v3082_v48, 1 }
 0x133   : > { %v470_v23 = vpop.permute.xlu0 %469  ;;  %v615_v32 = vsel %vm614_vm15, %v609_v53, %v2678_v15  ;;  %v4128_v15 = vunpack.i.h.bf16 %v3159_v33 }
 0x134   : > { %v475_v19 = vsel %vm471_vm9, %v2649_v37, %v470_v23  ;;  %v3459_v47 = vpop.permute.xlu1 %375  ;;  %677 = vrot.lane.b32.xlu1 %v659_v44, %s2964_s15  ;;  %675 = vrot.lane.b32.xlu0 %v658_v13, %s2964_s15  ;;  %v650_v37 = vsel %vm614_vm15, %v645_v12, %v2683_v45  ;;  %v4129_v45 = vunpack.i.h.bf16 %v3236_v38  ;;  %vm4131_vm9 = vcmask 408576  }
 0x135   : > { %v634_v59 = vsel %vm590_vm4, %v629_v41, %v475_v19  ;;  %v657_v25 = vpack.c.bf16 %v650_v37, %v615_v32  ;;  %v547_v18 = vsel %vm4131_vm9, %v2748_v10, %v2749_v39  ;;  %v4134_v41 = vunpack.i.l.bf16 %v3319_v29 }
 0x136   : > { %v523_v48 = vsel %vm4130_vm7, %v4129_v45, %v518_v60  ;;  %vm4136_vm7 = vcmask 400384   ;;  %v656_v13 = vpack.c.bf16 %v655_v55, %v655_v55 }
 0x13c   : > { %v3475_v11 = vpop.permute.xlu1 %564  ;;  %673 = vrot.lane.b32.xlu1 %v657_v25, %s2964_s15  ;;  %566 = vrot.lane.b32.xlu0 %v557_v5, %s2956_s6 }
 0x13d   : > { %v571_v30 = vsel %vm4136_vm7, %v3272_v61, %v3475_v11 }
 0x144   : > { %v494_v42 = vpop.permute.xlu1 %493 }
 0x145   : > { %v499_v1 = vsel %vm495_vm3, %v4128_v15, %v494_v42  ;;  %vm4133_vm3 = vcmask 1039360  }
 0x146   : > { %v639_v50 = vsel %vm596_vm5, %v634_v59, %v499_v1  ;;  %v762_v1 = vld [vmem:[#allocation2 + $0x48] sm:$0xf] }
 0x147   : > { %v644_v52 = vsel %vm602_vm11, %v639_v50, %v523_v48  ;;  %v763_v50 = vpack.c.bf16 %v762_v1, %v762_v1 }
 0x148   : > { %v649_v24 = vsel %vm608_vm13, %v644_v52, %v547_v18 }
 0x15d   : > { %v283_v0 = vpop.permute.xlu2 %282 }
 0x15e   : > { %v288_v58 = vsel %vm284_vm12, %v2713_v17, %v283_v0  ;;  %vm4135_vm12 = vmmov %vm4131_vm9  ;;  %vm693_vm9 = vcmask 130048  }
 0x15f   : > { %v546_v63 = vsel %vm4135_vm12, %v3274_v62, %v2748_v10  ;;  %v382_v62 = vsel %vm379_vm8, %v3289_v6, %v3459_v47 }
 0x160   : > { %v648_v26 = vsel %vm608_vm13, %v3263_v57, %v546_v63 }
 0x161   : > { %v653_v43 = vsel %vm614_vm15, %v648_v26, %v571_v30 }
 0x165   : > { %v358_v28 = vpop.permute.xlu2 %357 }
 0x166   : > { %v363_v54 = vsel %vm359_vm6, %v2743_v35, %v358_v28  ;;  %v2965_v35 = vmov 0  }
 0x167   : > { %2750 = vset.pattern.permute.xlu1 %v2965_v35  ;;  %2751 = vset.pattern.permute.xlu2 %v2965_v35 }
 0x168   : > { %665 = vperm.xlu1 %2750, %v662_v22   ;;  %2752 = vset.pattern.permute.xlu0 %v2965_v35 }
 0x16d   : > { %v378_v7 = vpop.permute.xlu2 %377 }
 0x16e   : > { %v383_v23 = vsel %vm379_vm8, %v3459_v47, %v378_v7 }
 0x175   : > { %v258_v33 = vpop.permute.xlu1 %257 }
 0x176   : > { %v233_v40 = vpop.permute.xlu0 %232  ;;  %v263_v3 = vsel %vm259_vm14, %v4134_v41, %v258_v33 }
 0x177   : > { %v238_v38 = vsel %vm4133_vm3, %v4132_v46, %v233_v40  ;;  %v583_v57 = vsel %vm578_vm1, %v3287_v9, %v233_v40 }
 0x178   : > { %v582_v49 = vsel %vm578_vm1, %v3101_v56, %v238_v38  ;;  %v589_v6 = vsel %vm584_vm2, %v583_v57, %v258_v33  ;;  %vm4137_vm1 = vmmov %vm4136_vm7 }
 0x179   : > { %v588_v31 = vsel %vm584_vm2, %v582_v49, %v263_v3  ;;  %v595_v16 = vsel %vm590_vm4, %v589_v6, %v283_v0  ;;  %v871_v3 = vld [vmem:[%s4117_s2 + $0x20] sm:$0x1] }
 0x17a   : > { %v594_v29 = vsel %vm590_vm4, %v588_v31, %v288_v58  ;;  %vm775_vm4 = vcmask 64512  }
 0x17d   : > { %v333_v34 = vpop.permute.xlu1 %332 }
 0x17e   : > { %v308_v2 = vpop.permute.xlu0 %307  ;;  %v338_v17 = vsel %vm334_vm10, %v2733_v14, %v333_v34  ;;  %vm683_vm10 = vcmask 580608  }
 0x17f   : > { %v313_v56 = vsel %vm309_vm0, %v2723_v27, %v308_v2  ;;  %v601_v51 = vsel %vm596_vm5, %v595_v16, %v308_v2 }
 0x180   : > { %v600_v36 = vsel %vm596_vm5, %v594_v29, %v313_v56  ;;  %v607_v21 = vsel %vm602_vm11, %v601_v51, %v333_v34 }
 0x181   : > { %v606_v14 = vsel %vm602_vm11, %v600_v36, %v338_v17  ;;  %v613_v9 = vsel %vm608_vm13, %v607_v21, %v358_v28  ;;  %vm877_vm11 = vcmask 31744  }
 0x182   : > { %v612_v27 = vsel %vm608_vm13, %v606_v14, %v363_v54  ;;  %v619_v32 = vsel %vm614_vm15, %v613_v9, %v383_v23 }
 0x183   : > { %v618_v61 = vsel %vm614_vm15, %v612_v27, %v382_v62 }
 0x184   : > { %v660_v8 = vpack.c.bf16 %v653_v43, %v618_v61  ;;  %v864_v61 = vld [vmem:[#allocation2 + $0x50] sm:$0x1] }
 0x185   : > { %v865_v6 = vpack.c.bf16 %v864_v61, %v864_v61 }
 0x186   : > { %679 = vrot.lane.b32.xlu2 %v660_v8, %s2964_s15 }
 0x1a6   : > { %v678_v20 = vpop.permute.xlu1 %677  ;;  %v676_v4 = vpop.permute.xlu0 %675 }
 0x1a7   : > { %v685_v44 = vsel %vm683_vm10, %v676_v4, %v678_v20 }
 0x1a8   : > { %717 = vmatpush.bf16.msra.mxu1 %v685_v44 }
 0x1ab   : > { %2493 = vmatmul.msk.bf16.vlgmr.msra.gmra.mxu1 %vm693_vm9, %v656_v13 }
 0x1ae   : > { %v674_v19 = vpop.permute.xlu1 %673  ;;  %v567_v53 = vpop.permute.xlu0 %566 }
 0x1af   : > { %v572_v59 = vsel %vm4137_vm1, %v3475_v11, %v567_v53  ;;  %v684_v12 = vsel %vm683_vm10, %v674_v19, %v676_v4  ;;  %v769_v11 = vld [vmem:[%s4117_s2 + $0x18] sm:$0xf] }
 0x1b0   : > { %v654_v37 = vsel %vm614_vm15, %v649_v24, %v572_v59  ;;  %704 = vmatpush.bf16.msra.mxu0 %v684_v12  ;;  %772 = vperm.xlu2 %2751, %v769_v11  }
 0x1b1   : > { %v661_v25 = vpack.c.bf16 %v654_v37, %v619_v32 }
 0x1b3   : > { %2492 = vmatmul.msk.bf16.vlgmr.msra.gmra.mxu0 %vm693_vm9, %v656_v13  ;;  %681 = vrot.lane.b32.xlu0 %v661_v25, %s2964_s15 }
 0x1bb   : > { %874 = vperm.xlu0 %2752, %v871_v3  }
 0x1da   : > { %v666_v60 = vpop.permute.xlu1 %665 }
 0x1e0   : > { %v680_v5 = vpop.permute.xlu2 %679 }
 0x1e1   : > { %v686_v47 = vsel %vm683_vm10, %v678_v20, %v680_v5 }
 0x1e2   : > { %730 = vmatpush.bf16.msra.mxu2 %v686_v47 }
 0x1e5   : > { %2494 = vmatmul.msk.bf16.vlgmr.msra.gmra.mxu2 %vm693_vm9, %v656_v13 }
 0x20a   : > { %v773_v36 = vpop.permute.xlu2 %772 }
 0x225   : > { %v682_v39 = vpop.permute.xlu0 %681 }
 0x226   : > { %756 = vmatpush.bf16.msrb.mxu0 %v682_v39  ;;  %v687_v10 = vsel %vm683_vm10, %v680_v5, %v682_v39 }
 0x227   : > { %743 = vmatpush.bf16.msra.mxu3 %v687_v10 }
 0x228   : > { %v719_v42 = vpop.f32.mrf.mxu1 }
 0x229   : > { %v3556_v15 = vadd.f32 %v719_v42, %v666_v60  ;;  %2496 = vmatmul.msk.bf16.vlgmr.msrb.gmra.mxu0 %vm693_vm9, %v656_v13 }
 0x22a   : > { %2495 = vmatmul.msk.bf16.vlgmr.msra.gmra.mxu3 %vm693_vm9, %v656_v13 }
 0x22b   : > { %v765_v45 = vpack.c.bf16 %v3556_v15, %v3556_v15 }
 0x22d   : > { %v783_v48 = vsel %vm596_vm5, %v765_v45, 0  ;;  %v3601_v39 = vpop.permute.xlu0 %874 }
 0x22e   : > { %814 = vmatpush.bf16.msrb.mxu2 %v783_v48 }
 0x230   : > { %v706_v18 = vpop.f32.mrf.mxu0  ;;  %v721_v52 = vpop.f32.mrf.mxu1 }
 0x231   : > { %v3563_v24 = vadd.f32 %v706_v18, %v666_v60  ;;  %2498 = vmatmul.msk.bf16.vlgmr.msrb.gmra.mxu2 %vm775_vm4, %v763_v50 }
 0x233   : > { %v764_v0 = vpack.c.bf16 %v3563_v24, %v3563_v24 }
 0x235   : > { %v780_v58 = vsel %vm596_vm5, %v764_v0, 0 }
 0x236   : > { %801 = vmatpush.bf16.msrb.mxu1 %v780_v58 }
 0x238   : > { %v708_v33 = vpop.f32.mrf.mxu0 }
 0x239   : > { %2497 = vmatmul.msk.bf16.vlgmr.msrb.gmra.mxu1 %vm775_vm4, %v763_v50 }
 0x268   : > { %v732_v40 = vpop.f32.mrf.mxu2 }
 0x269   : > { %v3570_v46 = vadd.f32 %v732_v40, %v666_v60 }
 0x26b   : > { %v766_v38 = vpack.c.bf16 %v3570_v46, %v3570_v46 }
 0x26d   : > { %v786_v49 = vsel %vm596_vm5, %v766_v38, 0 }
 0x26e   : > { %827 = vmatpush.bf16.msrb.mxu3 %v786_v49 }
 0x270   : > { %v734_v41 = vpop.f32.mrf.mxu2 }
 0x271   : > { %2499 = vmatmul.msk.bf16.vlgmr.msrb.gmra.mxu3 %vm775_vm4, %v763_v50 }
 0x2a6   : > { %v758_v31 = vpop.f32.mrf.mxu0 }
 0x2a7   : > { %v3579_v34 = vadd.f32 %v758_v31, %v666_v60 }
 0x2a9   : > { %v768_v28 = vpack.c.bf16 %v3579_v34, %v3579_v34 }
 0x2ab   : > { %v792_v2 = vsel %vm596_vm5, %v768_v28, 0 }
 0x2ac   : > { %853 = vmatpush.bf16.msra.mxu1 %v792_v2 }
 0x2ad   : > { %v745_v17 = vpop.f32.mrf.mxu3 }
 0x2ae   : > { %v3584_v63 = vadd.f32 %v745_v17, %v666_v60  ;;  %v760_v56 = vpop.f32.mrf.mxu0 }
 0x2af   : > { %2501 = vmatmul.msk.bf16.vlgmr.msra.gmra.mxu1 %vm775_vm4, %v763_v50 }
 0x2b0   : > { %v767_v29 = vpack.c.bf16 %v3584_v63, %v3584_v63 }
 0x2b2   : > { %v789_v30 = vsel %vm596_vm5, %v767_v29, 0 }
 0x2b3   : > { %840 = vmatpush.bf16.msra.mxu0 %v789_v30  ;;  %v1056_v30 = vlaneseq }
 0x2b4   : > { %v816_v54 = vpop.f32.mrf.mxu2 }
 0x2b5   : > { %v817_v14 = vadd.f32 %v816_v54, %v773_v36  ;;  %v747_v62 = vpop.f32.mrf.mxu3 }
 0x2b6   : > { %v803_v26 = vpop.f32.mrf.mxu1  ;;  %2500 = vmatmul.msk.bf16.vlgmr.msra.gmra.mxu0 %vm775_vm4, %v763_v50 }
 0x2b7   : > { %v860_v27 = vmax.f32 %v817_v14, 0.0  ;;  %v804_v43 = vadd.f32 %v803_v26, %v773_v36 }
 0x2b9   : > { %v867_v8 = vpack.c.bf16 %v860_v27, %v860_v27  ;;  %v859_v22 = vmax.f32 %v804_v43, 0.0  ;;  %v3605_v43 = vand.u32 127, %v1056_v30 }
 0x2bb   : > { %v866_v35 = vpack.c.bf16 %v859_v22, %v859_v22  ;;  %v885_v57 = vsel %vm584_vm2, %v867_v8, 0  ;;  %vm1062_vm1 = vcmp.ge.s32.totalorder %v3605_v43, 16  ;;  %v3627_v30 = vadd.s32 512, %v3605_v43 }
 0x2bc   : > { %916 = vmatpush.bf16.msra.mxu3 %v885_v57  ;;  %v818_v55 = vpop.f32.mrf.mxu2 }
 0x2bd   : > { %v882_v16 = vsel %vm584_vm2, %v866_v35, 0 }
 0x2be   : > { %903 = vmatpush.bf16.msra.mxu2 %v882_v16  ;;  %v805_v20 = vpop.f32.mrf.mxu1 }
 0x2bf   : > { %2503 = vmatmul.msk.bf16.vlgmr.msra.gmra.mxu3 %vm877_vm11, %v865_v6 }
 0x2c1   : > { %2502 = vmatmul.msk.bf16.vlgmr.msra.gmra.mxu2 %vm877_vm11, %v865_v6 }
 0x2f4   : > { %v829_v4 = vpop.f32.mrf.mxu3 }
 0x2f5   : > { %v830_v51 = vadd.f32 %v829_v4, %v773_v36 }
 0x2f7   : > { %v861_v44 = vmax.f32 %v830_v51, 0.0 }
 0x2f9   : > { %v868_v13 = vpack.c.bf16 %v861_v44, %v861_v44 }
 0x2fb   : > { %v888_v21 = vsel %vm584_vm2, %v868_v13, 0 }
 0x2fc   : > { %929 = vmatpush.bf16.msrb.mxu0 %v888_v21  ;;  %v831_v7 = vpop.f32.mrf.mxu3 }
 0x2ff   : > { %2504 = vmatmul.msk.bf16.vlgmr.msrb.gmra.mxu0 %vm877_vm11, %v865_v6 }
 0x32c   : > { %v855_v9 = vpop.f32.mrf.mxu1 }
 0x32d   : > { %v856_v23 = vadd.f32 %v855_v9, %v773_v36 }
 0x32f   : > { %v863_v19 = vmax.f32 %v856_v23, 0.0 }
 0x331   : > { %v870_v53 = vpack.c.bf16 %v863_v19, %v863_v19 }
 0x333   : > { %v842_v59 = vpop.f32.mrf.mxu0  ;;  %v894_v12 = vsel %vm584_vm2, %v870_v53, 0 }
 0x334   : > { %v843_v32 = vadd.f32 %v842_v59, %v773_v36  ;;  %955 = vmatpush.bf16.msrb.mxu2 %v894_v12  ;;  %v857_v37 = vpop.f32.mrf.mxu1 }
 0x336   : > { %v862_v25 = vmax.f32 %v843_v32, 0.0 }
 0x337   : > { %2506 = vmatmul.msk.bf16.vlgmr.msrb.gmra.mxu2 %vm877_vm11, %v865_v6 }
 0x338   : > { %v869_v5 = vpack.c.bf16 %v862_v25, %v862_v25 }
 0x33a   : > { %v891_v47 = vsel %vm584_vm2, %v869_v5, 0 }
 0x33b   : > { %v844_v11 = vpop.f32.mrf.mxu0  ;;  %942 = vmatpush.bf16.msrb.mxu1 %v891_v47 }
 0x33e   : > { %2505 = vmatmul.msk.bf16.vlgmr.msrb.gmra.mxu1 %vm877_vm11, %v865_v6 }
 0x342   : > { %v918_v10 = vpop.f32.mrf.mxu3 }
 0x343   : > { %v919_v60 = vadd.f32 %v918_v10, %v3601_v39 }
 0x344   : > { %v905_v42 = vpop.f32.mrf.mxu2 }
 0x345   : > { %v2508_v1 = vmul.f32 -1.442695, %v919_v60  ;;  %v906_v45 = vadd.f32 %v905_v42, %v3601_v39 }
 0x347   : > { %2843 = vpow2.f32 %v2508_v1  ;;  %v2507_v48 = vmul.f32 -1.442695, %v906_v45 }
 0x349   : > { %2845 = vpow2.f32 %v2507_v48 }
 0x34a   : > { %v920_v50 = vpop.f32.mrf.mxu3 }
 0x34c   : > { %v907_v18 = vpop.f32.mrf.mxu2 }
 0x34d   : > { %v2844_v52 = vpop.eup %2843 }
 0x34e   : > { %v977_v0 = vadd.f32 1.0, %v2844_v52 }
 0x34f   : > { %v2846_v58 = vpop.eup %2845 }
 0x350   : > { %2847 = vrcp.f32 %v977_v0  ;;  %v976_v33 = vadd.f32 1.0, %v2846_v58  ;;  %vm1001_vm2 = vweird.f32 %v977_v0  ;;  %v1007_v41 = vand.u32 2147483648, %v977_v0 }
 0x351   : > { %v1005_v28 = vand.u32 2147483647, %v977_v0 }
 0x352   : > { %2849 = vrcp.f32 %v976_v33  ;;  %vm986_vm15 = vweird.f32 %v976_v33  ;;  %v992_v2 = vand.u32 2147483648, %v976_v33  ;;  %v990_v56 = vand.u32 2147483647, %v976_v33 }
 0x353   : > { %v1008_v36 = vor.u32 1.1754944e-38, %v1007_v41  ;;  %vm1006_vm12 = vcmp.eq.f32.partialorder %v1005_v28, 8.507059e+37 }
 0x354   : > { %v993_v62 = vor.u32 1.1754944e-38, %v992_v2  ;;  %vm991_vm10 = vcmp.eq.f32.partialorder %v990_v56, 8.507059e+37 }
 0x356   : > { %v2848_v40 = vpop.eup %2847 }
 0x357   : > { %v997_v38 = vmul.f32 %v2848_v40, %v977_v0  ;;  %vm1002_vm13 = vweird.f32 %v2848_v40 }
 0x358   : > { %v2850_v49 = vpop.eup %2849  ;;  %vm1003_vm3 = vmor %vm1001_vm2, %vm1002_vm13 }
 0x359   : > { %v982_v3 = vmul.f32 %v2850_v49, %v976_v33  ;;  %v998_v31 = vsub.f32 1.0, %v997_v38  ;;  %vm987_vm8 = vweird.f32 %v2850_v49  ;;  %v3623_v33 = vadd.s32 256, %v3605_v43 }
 0x35a   : > { %vm988_vm7 = vmor %vm986_vm15, %vm987_vm8 }
 0x35b   : > { %v983_v17 = vsub.f32 1.0, %v982_v3  ;;  %v999_v29 = vmul.f32 %v2848_v40, %v998_v31 }
 0x35d   : > { %v984_v54 = vmul.f32 %v2850_v49, %v983_v17  ;;  %v1000_v14 = vadd.f32 %v2848_v40, %v999_v29 }
 0x35f   : > { %v985_v26 = vadd.f32 %v2850_v49, %v984_v54  ;;  %v1004_v27 = vsel %vm1003_vm3, %v2848_v40, %v1000_v14 }
 0x360   : > { %v1009_v61 = vsel %vm1006_vm12, %v1008_v36, %v1004_v27 }
 0x361   : > { %v989_v8 = vsel %vm988_vm7, %v2850_v49, %v985_v26  ;;  %v1098_v35 = vperm.slane %v1009_v61, 0  ;;  %vm1069_vm7 = vcmp.lt.s32.totalorder %v3623_v33, 272 }
 0x362   : > { %v994_v22 = vsel %vm991_vm10, %v993_v62, %v989_v8 }
 0x363   : > { %v1097_v57 = vperm.slane %v994_v22, 0  ;;  %v3610_v55 = vmul.f32 %v1098_v35, %v3556_v15 }
 0x365   : > { %v1102_v6 = vmul.f32 %v1097_v57, %v3563_v24 }
 0x367   : > { %v3612_v16 = vsel %vm1062_vm1, %v1102_v6, 0.0 }
 0x368   : > { %1122 = vrot.lane.b32.xlu1 %v3612_v16, %s2948_s25  ;;  %v2753_v20 = vpack.i.bf16 %v3610_v55, %v3612_v16 }
 0x36a   : > { %2754 = vrot.lane.b32.xlu2 %v2753_v20, %s2959_s9 }
 0x37c   : > { %v931_v4 = vpop.f32.mrf.mxu0 }
 0x37d   : > { %v932_v44 = vadd.f32 %v931_v4, %v3601_v39 }
 0x37f   : > { %v2509_v13 = vmul.f32 -1.442695, %v932_v44 }
 0x381   : > { %2851 = vpow2.f32 %v2509_v13 }
 0x384   : > { %v933_v51 = vpop.f32.mrf.mxu0 }
 0x387   : > { %v2852_v24 = vpop.eup %2851 }
 0x388   : > { %v978_v21 = vadd.f32 1.0, %v2852_v24 }
 0x38a   : > { %2853 = vrcp.f32 %v978_v21  ;;  %vm1016_vm11 = vweird.f32 %v978_v21  ;;  %v1022_v42 = vand.u32 2147483648, %v978_v21 }
 0x38c   : > { %v1023_v48 = vor.u32 1.1754944e-38, %v1022_v42 }
 0x390   : > { %v2854_v23 = vpop.eup %2853 }
 0x391   : > { %v1012_v12 = vmul.f32 %v2854_v23, %v978_v21  ;;  %vm1017_vm2 = vweird.f32 %v2854_v23 }
 0x392   : > { %vm1018_vm13 = vmor %vm1016_vm11, %vm1017_vm2 }
 0x393   : > { %v1013_v37 = vsub.f32 1.0, %v1012_v12 }
 0x395   : > { %v1014_v60 = vmul.f32 %v2854_v23, %v1013_v37 }
 0x397   : > { %v1015_v1 = vadd.f32 %v2854_v23, %v1014_v60 }
 0x399   : > { %v1019_v52 = vsel %vm1018_vm13, %v2854_v23, %v1015_v1  ;;  %vm1079_vm13 = vcmp.ge.s32.totalorder %v3623_v33, 304 }
 0x3ba   : > { %v957_v15 = vpop.f32.mrf.mxu2 }
 0x3bb   : > { %v958_v7 = vadd.f32 %v957_v15, %v3601_v39  ;;  %v944_v9 = vpop.f32.mrf.mxu1 }
 0x3bc   : > { %v945_v19 = vadd.f32 %v944_v9, %v3601_v39  ;;  %v1020_v39 = vand.u32 2147483647, %v978_v21 }
 0x3bd   : > { %v2511_v53 = vmul.f32 -1.442695, %v958_v7 }
 0x3be   : > { %v2510_v59 = vmul.f32 -1.442695, %v945_v19  ;;  %vm1021_vm15 = vcmp.eq.f32.partialorder %v1020_v39, 8.507059e+37 }
 0x3bf   : > { %2855 = vpow2.f32 %v2511_v53  ;;  %v1024_v49 = vsel %vm1021_vm15, %v1023_v48, %v1019_v52 }
 0x3c0   : > { %2857 = vpow2.f32 %v2510_v59  ;;  %v1099_v56 = vperm.slane %v1024_v49, 0 }
 0x3c2   : > { %v959_v32 = vpop.f32.mrf.mxu2  ;;  %v1104_v8 = vmul.f32 %v1099_v56, %v3570_v46 }
 0x3c3   : > { %v946_v25 = vpop.f32.mrf.mxu1 }
 0x3c4   : > { %v2755_v46 = vpop.permute.xlu2 %2754 }
 0x3c5   : > { %v2856_v5 = vpop.eup %2855  ;;  %v2757_v13 = vunpack.i.h.bf16 %v2755_v46  ;;  %v2756_v24 = vunpack.i.l.bf16 %v2755_v46 }
 0x3c6   : > { %v2858_v47 = vpop.eup %2857  ;;  %v980_v11 = vadd.f32 1.0, %v2856_v5 }
 0x3c7   : > { %v979_v10 = vadd.f32 1.0, %v2858_v47 }
 0x3c8   : > { %2859 = vrcp.f32 %v980_v11  ;;  %v1052_v38 = vand.u32 2147483648, %v980_v11  ;;  %v1050_v3 = vand.u32 2147483647, %v980_v11  ;;  %vm1046_vm12 = vweird.f32 %v980_v11 }
 0x3c9   : > { %2861 = vrcp.f32 %v979_v10  ;;  %v1037_v31 = vand.u32 2147483648, %v979_v10  ;;  %v1035_v2 = vand.u32 2147483647, %v979_v10  ;;  %vm1031_vm1 = vweird.f32 %v979_v10 }
 0x3ca   : > { %v1053_v29 = vor.u32 1.1754944e-38, %v1052_v38  ;;  %vm1051_vm11 = vcmp.eq.f32.partialorder %v1050_v3, 8.507059e+37 }
 0x3cb   : > { %v1038_v14 = vor.u32 1.1754944e-38, %v1037_v31  ;;  %vm1036_vm15 = vcmp.eq.f32.partialorder %v1035_v2, 8.507059e+37 }
 0x3ce   : > { %v2860_v45 = vpop.eup %2859 }
 0x3cf   : > { %v2862_v50 = vpop.eup %2861  ;;  %v1042_v18 = vmul.f32 %v2860_v45, %v980_v11  ;;  %vm1047_vm8 = vweird.f32 %v2860_v45 }
 0x3d0   : > { %v1027_v0 = vmul.f32 %v2862_v50, %v979_v10  ;;  %vm1032_vm3 = vweird.f32 %v2862_v50  ;;  %vm1048_vm10 = vmor %vm1046_vm12, %vm1047_vm8  ;;  %vm1086_vm8 = vcmp.lt.s32.totalorder %v3627_v30, 560 }
 0x3d1   : > { %v1043_v58 = vsub.f32 1.0, %v1042_v18  ;;  %vm1033_vm2 = vmor %vm1031_vm1, %vm1032_vm3  ;;  %vm4138_vm3 = vcmask 1048064  }
 0x3d2   : > { %v1028_v40 = vsub.f32 1.0, %v1027_v0  ;;  %vm1094_vm12 = vmor %vm1069_vm7, %vm1079_vm13  ;;  %vm4139_vm7 = vcmask 1039360   ;;  %vm1259_vm13 = vcmask 474112  }
 0x3d3   : > { %v1044_v41 = vmul.f32 %v2860_v45, %v1043_v58  ;;  %v1119_v4 = vsel %vm1094_vm12, %v1104_v8, 0.0  ;;  %v1140_v15 = vsel %vm4139_vm7, %v2756_v24, %v2757_v13  ;;  %vm4141_vm1 = vmmov %vm4139_vm7 }
 0x3d4   : > { %v1029_v28 = vmul.f32 %v2862_v50, %v1028_v40  ;;  %v3643_v23 = vmax.f32 %v3612_v16, %v1140_v15 }
 0x3d5   : > { %v1045_v17 = vadd.f32 %v2860_v45, %v1044_v41 }
 0x3d6   : > { %v1030_v36 = vadd.f32 %v2862_v50, %v1029_v28 }
 0x3d7   : > { %v1049_v54 = vsel %vm1048_vm10, %v2860_v45, %v1045_v17  ;;  %vm4140_vm10 = vmmov %vm4139_vm7  ;;  %vm1326_vm7 = vcmask 261120  }
 0x3d8   : > { %v1054_v62 = vsel %vm1051_vm11, %v1053_v29, %v1049_v54  ;;  %v1034_v26 = vsel %vm1033_vm2, %v2862_v50, %v1030_v36  ;;  %vm4142_vm11 = vmmov %vm4141_vm1 }
 0x3d9   : > { %v1101_v27 = vperm.slane %v1054_v62, 0  ;;  %v1039_v61 = vsel %vm1036_vm15, %v1038_v14, %v1034_v26  ;;  %vm4143_vm2 = vmmov %vm4138_vm3 }
 0x3da   : > { %v1100_v22 = vperm.slane %v1039_v61, 0  ;;  %v1123_v6 = vpop.permute.xlu1 %1122  ;;  %vm4144_vm15 = vmmov %vm4143_vm2 }
 0x3db   : > { %v1106_v35 = vmul.f32 %v1101_v27, %v3579_v34  ;;  %vm4146_vm12 = vmmov %vm4143_vm2 }
 0x3dc   : > { %v1105_v57 = vmul.f32 %v1100_v22, %v3584_v63 }
 0x3dd   : > { %v1121_v20 = vsel %vm1086_vm8, %v1106_v35, 0.0  ;;  %vm4145_vm8 = vmmov %vm4143_vm2 }
 0x3de   : > { %v1124_v51 = vsel %vm4138_vm3, %v1123_v6, %v1121_v20  ;;  %v2758_v44 = vpack.i.bf16 %v1105_v57, %v1119_v4  ;;  %vm4147_vm3 = vmmov %vm4143_vm2 }
 0x3df   : > { %1138 = vrot.lane.b32.xlu2 %v1124_v51, %s2959_s9 }
 0x3e0   : > { %2759 = vrot.lane.b32.xlu1 %v2758_v44, %s2959_s9 }
 0x439   : > { %v1139_v12 = vpop.permute.xlu2 %1138 }
 0x43a   : > { %v1153_v32 = vmax.f32 %v1121_v20, %v1139_v12 }
 0x452   : > { %v2760_v21 = vpop.permute.xlu1 %2759 }
 0x453   : > { %v2762_v7 = vunpack.i.h.bf16 %v2760_v21  ;;  %v2761_v34 = vunpack.i.l.bf16 %v2760_v21 }
 0x455   : > { %v1141_v63 = vsel %vm4140_vm10, %v2757_v13, %v2761_v34  ;;  %v1142_v9 = vsel %vm4141_vm1, %v2761_v34, %v2762_v7  ;;  %v1143_v16 = vsel %vm4142_vm11, %v2762_v7, %v1139_v12  ;;  %vm1736_vm10 = vcmask 965632  }
 0x456   : > { %v3646_v19 = vmax.f32 %v3610_v55, %v1141_v63  ;;  %v3648_v53 = vmax.f32 %v1119_v4, %v1142_v9  ;;  %v3657_v55 = vmax.f32 %v1105_v57, %v1143_v16 }
 0x458   : > { %1157 = vrot.lane.b32.xlu2 %v3646_v19, %s2948_s25  ;;  %v2763_v59 = vpack.i.bf16 %v3648_v53, %v3643_v23  ;;  %v2778_v37 = vpack.i.bf16 %v3646_v19, %v1153_v32  ;;  %v2783_v25 = vpack.i.bf16 %v3657_v55, %v3648_v53 }
 0x45a   : > { %2764 = vrot.lane.b32.xlu0 %v2763_v59, %s2948_s25 }
 0x460   : > { %2779 = vrot.lane.b32.xlu2 %v2778_v37, %s2966_s23 }
 0x462   : > { %1249 = vrot.lane.b32.xlu0 %v3643_v23, %s2966_s23 }
 0x468   : > { %2784 = vrot.lane.b32.xlu2 %v2783_v25, %s2960_s10 }
 0x470   : > { %2809 = vrot.lane.b32.xlu2 %v2783_v25, %s2958_s8 }
 0x478   : > { %1551 = vrot.lane.b32.xlu2 %v3643_v23, %s2963_s14 }
 0x4b2   : > { %v1158_v5 = vpop.permute.xlu2 %1157 }
 0x4ba   : > { %v3669_v60 = vpop.permute.xlu2 %2779 }
 0x4bb   : > { %v2782_v1 = vunpack.i.h.bf16 %v3669_v60  ;;  %v2781_v26 = vunpack.i.l.bf16 %v3669_v60 }
 0x4c2   : > { %v3721_v17 = vpop.permute.xlu2 %2784 }
 0x4c3   : > { %v2787_v34 = vunpack.i.h.bf16 %v3721_v17  ;;  %v2786_v63 = vunpack.i.l.bf16 %v3721_v17 }
 0x4ca   : > { %v3725_v29 = vpop.permute.xlu2 %2809 }
 0x4cc   : > { %v2765_v47 = vpop.permute.xlu0 %2764 }
 0x4cd   : > { %v2766_v11 = vunpack.i.l.bf16 %v2765_v47  ;;  %v2767_v48 = vunpack.i.h.bf16 %v2765_v47 }
 0x4cf   : > { %v3667_v10 = vsel %vm4143_vm2, %v2766_v11, %v1153_v32  ;;  %v3686_v50 = vsel %vm4144_vm15, %v2767_v48, %v1158_v5  ;;  %v3693_v52 = vsel %vm4145_vm8, %v1158_v5, %v2766_v11  ;;  %v1544_v5 = vsel %vm309_vm0, %v2786_v63, %v2787_v34 }
 0x4d0   : > { %v2768_v42 = vpack.i.bf16 %v3667_v10, %v3657_v55  ;;  %v2813_v18 = vpack.i.bf16 %v3667_v10, %v3686_v50  ;;  %v2833_v0 = vpack.i.bf16 %v3646_v19, %v3693_v52  ;;  %v2838_v58 = vpack.i.bf16 %v3667_v10, %v3693_v52 }
 0x4d2   : > { %2769 = vrot.lane.b32.xlu1 %v2768_v42, %s2948_s25  ;;  %v1552_v14 = vpop.permute.xlu2 %1551 }
 0x4d4   : > { %v3675_v39 = vpop.permute.xlu0 %1249 }
 0x4d5   : > { %v3681_v45 = vsel %vm1259_vm13, %v3675_v39, %v2782_v1 }
 0x4da   : > { %2774 = vrot.lane.b32.xlu1 %v2783_v25, %s2966_s23 }
 0x4e2   : > { %1534 = vrot.lane.b32.xlu1 %v3643_v23, %s2960_s10 }
 0x4ea   : > { %2814 = vrot.lane.b32.xlu1 %v2813_v18, %s2960_s10 }
 0x4f2   : > { %2824 = vrot.lane.b32.xlu1 %v2813_v18, %s2958_s8 }
 0x4fa   : > { %2834 = vrot.lane.b32.xlu1 %v2833_v0, %s2958_s8 }
 0x502   : > { %2839 = vrot.lane.b32.xlu1 %v2838_v58, %s2963_s14 }
 0x544   : > { %v2770_v40 = vpop.permute.xlu1 %2769 }
 0x545   : > { %v2772_v38 = vunpack.i.h.bf16 %v2770_v40  ;;  %v2771_v49 = vunpack.i.l.bf16 %v2770_v40 }
 0x547   : > { %v3702_v41 = vsel %vm4146_vm12, %v2771_v49, %v2767_v48  ;;  %v3705_v3 = vsel %vm4147_vm3, %v2772_v38, %v2771_v49 }
 0x548   : > { %v2788_v31 = vpack.i.bf16 %v3646_v19, %v3705_v3  ;;  %v2818_v28 = vpack.i.bf16 %v3702_v41, %v3686_v50  ;;  %v2793_v2 = vpack.i.bf16 %v3705_v3, %v3702_v41 }
 0x54a   : > { %2789 = vrot.lane.b32.xlu0 %v2788_v31, %s2963_s14  ;;  %2819 = vrot.lane.b32.xlu2 %v2818_v28, %s2963_s14 }
 0x54c   : > { %v3723_v56 = vpop.permute.xlu1 %2774 }
 0x54d   : > { %v2777_v62 = vunpack.i.h.bf16 %v3723_v56 }
 0x54f   : > { %v1263_v35 = vsel %vm1259_vm13, %v2777_v62, %v2781_v26  ;;  %v2776_v26 = vunpack.i.l.bf16 %v3723_v56 }
 0x552   : > { %2794 = vrot.lane.b32.xlu0 %v2793_v2, %s2960_s10  ;;  %2829 = vrot.lane.b32.xlu2 %v2833_v0, %s2960_s10 }
 0x554   : > { %v1535_v36 = vpop.permute.xlu1 %1534 }
 0x55a   : > { %2799 = vrot.lane.b32.xlu0 %v2793_v2, %s2958_s8 }
 0x55c   : > { %v3731_v61 = vpop.permute.xlu1 %2814 }
 0x55d   : > { %v2816_v20 = vunpack.i.l.bf16 %v3731_v61  ;;  %v3776_v38 = vunpack.i.h.bf16 %v3731_v61 }
 0x562   : > { %2804 = vrot.lane.b32.xlu0 %v2783_v25, %s2963_s14 }
 0x564   : > { %v3749_v24 = vpop.permute.xlu1 %2824 }
 0x565   : > { %v2826_v9 = vunpack.i.l.bf16 %v3749_v24  ;;  %v2827_v61 = vunpack.i.h.bf16 %v3749_v24 }
 0x56a   : > { %1517 = vrot.lane.b32.xlu0 %v3643_v23, %s2958_s8 }
 0x5a4   : > { %v3735_v22 = vpop.permute.xlu2 %2819 }
 0x5a5   : > { %v2822_v4 = vunpack.i.h.bf16 %v3735_v22  ;;  %v2821_v51 = vunpack.i.l.bf16 %v3735_v22 }
 0x5a7   : > { %v1224_v13 = vsel %vm359_vm6, %v2821_v51, %v2822_v4 }
 0x5ac   : > { %v2830_v15 = vpop.permute.xlu2 %2829 }
 0x5ad   : > { %v2832_v59 = vunpack.i.h.bf16 %v2830_v15  ;;  %v2831_v18 = vunpack.i.l.bf16 %v2830_v15 }
 0x5af   : > { %v1543_v42 = vsel %vm309_vm0, %v2832_v59, %v2786_v63  ;;  %v2811_v63 = vunpack.i.l.bf16 %v3725_v29 }
 0x5bc   : > { %v3727_v54 = vpop.permute.xlu0 %2789 }
 0x5bd   : > { %v2792_v37 = vunpack.i.h.bf16 %v3727_v54 }
 0x5c4   : > { %v2795_v27 = vpop.permute.xlu0 %2794 }
 0x5c5   : > { %v3733_v8 = vunpack.i.h.bf16 %v2795_v27  ;;  %v2796_v6 = vunpack.i.l.bf16 %v2795_v27  ;;  %v2791_v27 = vunpack.i.l.bf16 %v3727_v54 }
 0x5c7   : > { %v1276_v57 = vpack.c.bf16 %v1263_v35, %v3733_v8  ;;  %v1205_v46 = vsel %vm309_vm0, %v2816_v20, %v2796_v6  ;;  %v1559_v35 = vsel %vm359_vm6, %v1552_v14, %v2792_v37 }
 0x5c8   : > { %v1241_v21 = vpack.c.bf16 %v1224_v13, %v1205_v46  ;;  %v1225_v13 = vsel %vm359_vm6, %v2822_v4, %v2791_v27  ;;  %v1204_v4 = vsel %vm309_vm0, %v2831_v18, %v2816_v20 }
 0x5c9   : > { %1305 = vrot.lane.b32.xlu1 %v1276_v57, %s2967_s24  ;;  %v2835_v57 = vpop.permute.xlu1 %2834 }
 0x5cc   : > { %v2800_v44 = vpop.permute.xlu0 %2799 }
 0x5cd   : > { %v2801_v7 = vunpack.i.l.bf16 %v2800_v44  ;;  %v2802_v40 = vunpack.i.h.bf16 %v2800_v44  ;;  %v1262_v44 = vsel %vm1259_vm13, %v2776_v26, %v2777_v62 }
 0x5cf   : > { %v1186_v32 = vsel %vm259_vm14, %v2826_v9, %v2801_v7  ;;  %v1187_v49 = vsel %vm259_vm14, %v2801_v7, %v2802_v40  ;;  %v3787_v28 = vpack.c.bf16 %v2802_v40, %v3705_v3  ;;  %v1542_v3 = vsel %vm309_vm0, %v1535_v36, %v2832_v59  ;;  %v1867_v40 = vld [vmem:[%s4117_s2 + $0x28] sm:$0xff] }
 0x5d0   : > { %v1236_v47 = vpack.c.bf16 %v1186_v32, %v3686_v50  ;;  %v1203_v50 = vsel %vm309_vm0, %v3776_v38, %v2831_v18  ;;  %v1237_v2 = vpack.c.bf16 %v1187_v49, %v3702_v41  ;;  %v1576_v41 = vpack.c.bf16 %v1559_v35, %v1542_v3  ;;  %v1269_v3 = vld [vmem:[#allocation2 + $0x18] sm:$0xff] }
 0x5d1   : > { %1419 = vrot.lane.b32.xlu1 %v1241_v21, %s2968_s26  ;;  %v1272_v31 = vpack.c.bf16 %v3675_v39, %v1203_v50  ;;  %v1206_v39 = vsel %vm309_vm0, %v2796_v6, %v3733_v8  ;;  %v2836_v21 = vunpack.i.l.bf16 %v2835_v57  ;;  %v1261_v36 = vsel %vm1259_vm13, %v2782_v1, %v2776_v26  ;;  %v2840_v62 = vpop.permute.xlu1 %2839 }
 0x5d2   : > { %v1275_v15 = vpack.c.bf16 %v1262_v44, %v1206_v39  ;;  %v1242_v7 = vpack.c.bf16 %v1225_v13, %v1206_v39  ;;  %v1274_v14 = vpack.c.bf16 %v1261_v36, %v1205_v46  ;;  %v2841_v6 = vunpack.i.l.bf16 %v2840_v62 }
 0x5d3   : > { %v1185_v56 = vsel %vm259_vm14, %v2836_v21, %v2826_v9  ;;  %v1273_v1 = vpack.c.bf16 %v3681_v45, %v1204_v4  ;;  %v2837_v46 = vunpack.i.h.bf16 %v2835_v57  ;;  %v1184_v20 = vsel %vm259_vm14, %v2827_v61, %v2836_v21 }
 0x5d4   : > { %v3755_v12 = vpop.permute.xlu0 %2804  ;;  %v1235_v54 = vpack.c.bf16 %v1185_v56, %v3693_v52  ;;  %v1223_v52 = vsel %vm359_vm6, %v2841_v6, %v2821_v51  ;;  %v1234_v51 = vpack.c.bf16 %v1184_v20, %v3667_v10  ;;  %v2812_v45 = vunpack.i.h.bf16 %v3725_v29  ;;  %v1232_v20 = vld [vmem:[#allocation2 + $0x10] sm:$0xff] }
 0x5d5   : > { %v2807_v16 = vunpack.i.h.bf16 %v3755_v12  ;;  %v2806_v25 = vunpack.i.l.bf16 %v3755_v12  ;;  %v1240_v60 = vpack.c.bf16 %v1223_v52, %v1204_v4  ;;  %v1526_v22 = vsel %vm259_vm14, %v2837_v46, %v2811_v63  ;;  %v1838_v12 = vld [vmem:[%s4117_s2] sm:$0xff] }
 0x5d6   : > { %v1572_v9 = vpack.c.bf16 %v1526_v22, %v3646_v19  ;;  %v2842_v32 = vunpack.i.h.bf16 %v2840_v62 }
 0x5d7   : > { %v1561_v11 = vsel %vm359_vm6, %v2806_v25, %v2807_v16  ;;  %v1560_v48 = vsel %vm359_vm6, %v2792_v37, %v2806_v25  ;;  %v1527_v37 = vsel %vm259_vm14, %v2811_v63, %v2812_v45 }
 0x5d8   : > { %v3770_v0 = vpack.c.bf16 %v1561_v11, %v1544_v5  ;;  %v3772_v58 = vpack.c.bf16 %v1560_v48, %v1543_v42  ;;  %v1222_v5 = vsel %vm359_vm6, %v2842_v32, %v2841_v6  ;;  %v1573_v19 = vpack.c.bf16 %v1527_v37, %v3648_v53 }
 0x5d9   : > { %1409 = vrot.lane.b32.xlu1 %v1236_v47, %s2968_s26  ;;  %v1243_v53 = vpack.c.bf16 %v2791_v27, %v3733_v8  ;;  %v1562_v29 = vsel %vm359_vm6, %v2807_v16, %v2842_v32  ;;  %v1528_v11 = vsel %vm259_vm14, %v2812_v45, %v2827_v61  ;;  %v1545_v42 = vsel %vm309_vm0, %v2787_v34, %v3776_v38 }
 0x5da   : > { %1605 = vrot.lane.b32.xlu0 %v3770_v0, %s2958_s8  ;;  %1603 = vrot.lane.b32.xlu2 %v3772_v58, %s2958_s8  ;;  %v1579_v8 = vpack.c.bf16 %v1562_v29, %v1545_v42  ;;  %v1574_v48 = vpack.c.bf16 %v1528_v11, %v3657_v55  ;;  %v1575_v16 = vpack.c.bf16 %v2827_v61, %v3667_v10  ;;  %v1953_v55 = vld [vmem:[%s4117_s2 + $0x30] sm:$0x1]  ;;  %v1839_v10 = vld [vmem:[%s4117_s2 + $0x8] sm:$0xff]  ;;  %vm1307_vm0 = vcmask 572416  }
 0x5db   : > { %vm1425_vm6 = vcmask 637952   ;;  %v1231_v61 = vld [vmem:[#allocation2 + $0x8] sm:$0xff] }
 0x5dc   : > { %v1518_v59 = vpop.permute.xlu0 %1517  ;;  %v1233_v22 = vpack.c.bf16 %v1232_v20, %v1231_v61 }
 0x5dd   : > { %v1525_v24 = vsel %vm259_vm14, %v1518_v59, %v2837_v46 }
 0x5de   : > { %v1571_v25 = vpack.c.bf16 %v1525_v24, %v3643_v23  ;;  %v1580_v23 = vpack.c.bf16 %v2842_v32, %v3776_v38  ;;  %v2159_v38 = vld [vmem:[%s4117_s2 + $0x38] sm:$0x7] }
 0x5e1   : > { %1297 = vrot.lane.b32.xlu1 %v1272_v31, %s2967_s24 }
 0x5e2   : > { %1295 = vrot.lane.b32.xlu0 %v3787_v28, %s2967_s24  ;;  %1293 = vrot.lane.b32.xlu2 %v1237_v2, %s2967_s24 }
 0x5e9   : > { %1726 = vrot.lane.b32.xlu1 %v1576_v41, %s2969_s27 }
 0x5ea   : > { %1303 = vrot.lane.b32.xlu0 %v1275_v15, %s2967_s24  ;;  %1421 = vrot.lane.b32.xlu2 %v1242_v7, %s2968_s26 }
 0x5f1   : > { %1289 = vrot.lane.b32.xlu1 %v1235_v54, %s2967_s24 }
 0x5f2   : > { %1411 = vrot.lane.b32.xlu2 %v1237_v2, %s2968_s26  ;;  %1301 = vrot.lane.b32.xlu0 %v1274_v14, %s2967_s24 }
 0x5f9   : > { %1417 = vrot.lane.b32.xlu1 %v1240_v60, %s2968_s26 }
 0x5fa   : > { %1291 = vrot.lane.b32.xlu0 %v1236_v47, %s2967_s24  ;;  %1299 = vrot.lane.b32.xlu2 %v1273_v1, %s2967_s24  ;;  %v1239_v47 = vpack.c.bf16 %v1222_v5, %v1203_v50 }
 0x601   : > { %1407 = vrot.lane.b32.xlu1 %v1235_v54, %s2968_s26 }
 0x602   : > { %1287 = vrot.lane.b32.xlu0 %v1234_v51, %s2967_s24  ;;  %1593 = vrot.lane.b32.xlu2 %v1572_v9, %s2958_s8 }
 0x609   : > { %1716 = vrot.lane.b32.xlu1 %v1571_v25, %s2969_s27 }
 0x60a   : > { %1595 = vrot.lane.b32.xlu0 %v1573_v19, %s2958_s8  ;;  %1415 = vrot.lane.b32.xlu2 %v1239_v47, %s2968_s26  ;;  %v1569_v47 = vld [vmem:[#allocation2 + $0x30] sm:$0xff] }
 0x611   : > { %1591 = vrot.lane.b32.xlu1 %v1571_v25, %s2958_s8 }
 0x612   : > { %1405 = vrot.lane.b32.xlu0 %v1234_v51, %s2968_s26  ;;  %1728 = vrot.lane.b32.xlu2 %v3772_v58, %s2969_s27 }
 0x619   : > { %1609 = vrot.lane.b32.xlu1 %v1580_v23, %s2958_s8 }
 0x61a   : > { %1601 = vrot.lane.b32.xlu0 %v1576_v41, %s2958_s8  ;;  %1718 = vrot.lane.b32.xlu2 %v1572_v9, %s2969_s27  ;;  %v1270_v41 = vld [vmem:[#allocation2 + $0x20] sm:$0xff] }
 0x61b   : > { %v3902_v13 = vpack.c.bf16 %v1270_v41, %v1269_v3 }
 0x621   : > { %1730 = vrot.lane.b32.xlu1 %v3770_v0, %s2969_s27 }
 0x622   : > { %1423 = vrot.lane.b32.xlu0 %v1243_v53, %s2968_s26  ;;  %1413 = vrot.lane.b32.xlu2 %v3787_v28, %s2968_s26 }
 0x629   : > { %1720 = vrot.lane.b32.xlu1 %v1573_v19, %s2969_s27  ;;  %v1568_v19 = vld [vmem:[#allocation2 + $0x28] sm:$0xff] }
 0x62a   : > { %1607 = vrot.lane.b32.xlu0 %v1579_v8, %s2958_s8  ;;  %1597 = vrot.lane.b32.xlu2 %v1574_v48, %s2958_s8  ;;  %v1570_v53 = vpack.c.bf16 %v1569_v47, %v1568_v19 }
 0x631   : > { %1842 = vperm.xlu1 %2750, %v1838_v12  }
 0x632   : > { %1599 = vrot.lane.b32.xlu0 %v1575_v16, %s2958_s8  ;;  %1732 = vrot.lane.b32.xlu2 %v1579_v8, %s2969_s27 }
 0x634   : > { %v3873_v17 = vpop.permute.xlu2 %1603 }
 0x639   : > { %1956 = vperm.xlu1 %2750, %v1953_v55  }
 0x63a   : > { %1734 = vrot.lane.b32.xlu0 %v1580_v23, %s2969_s27  ;;  %1722 = vrot.lane.b32.xlu2 %v1574_v48, %s2969_s27 }
 0x63b   : > { %v3880_v34 = vpop.permute.xlu1 %1305 }
 0x63c   : > { %v1294_v18 = vpop.permute.xlu2 %1293 }
 0x642   : > { %1724 = vrot.lane.b32.xlu0 %v1575_v16, %s2969_s27  ;;  %1847 = vperm.xlu2 %2751, %v1839_v10  }
 0x643   : > { %v1420_v0 = vpop.permute.xlu1 %1419 }
 0x644   : > { %v3886_v58 = vpop.permute.xlu2 %1421 }
 0x645   : > { %v1432_v21 = vsel %vm1425_vm6, %v1420_v0, %v3886_v58 }
 0x64a   : > { %1870 = vperm.xlu0 %2752, %v1867_v40   ;;  %2162 = vperm.xlu2 %2751, %v2159_v38  }
 0x64b   : > { %v1410_v50 = vpop.permute.xlu1 %1409 }
 0x64c   : > { %v3894_v49 = vpop.permute.xlu0 %1605  ;;  %v3896_v31 = vpop.permute.xlu2 %1411 }
 0x64d   : > { %v1428_v14 = vsel %vm1425_vm6, %v1410_v50, %v3896_v31  ;;  %v1617_v62 = vsel %vm259_vm14, %v3873_v17, %v3894_v49 }
 0x653   : > { %v1298_v28 = vpop.permute.xlu1 %1297 }
 0x654   : > { %v1296_v2 = vpop.permute.xlu0 %1295  ;;  %v1300_v26 = vpop.permute.xlu2 %1299 }
 0x655   : > { %v1312_v27 = vsel %vm1307_vm0, %v1298_v28, %v1300_v26  ;;  %v1311_v44 = vsel %vm1307_vm0, %v1294_v18, %v1296_v2 }
 0x656   : > { %1336 = vmatpush.bf16.msrb.mxu3 %v1312_v27 }
 0x65b   : > { %v1727_v35 = vpop.permute.xlu1 %1726 }
 0x65c   : > { %v1304_v57 = vpop.permute.xlu0 %1303  ;;  %v3906_v15 = vpop.permute.xlu2 %1593 }
 0x65d   : > { %v1315_v39 = vsel %vm1307_vm0, %v1304_v57, %v3880_v34 }
 0x65e   : > { %1378 = vmatpush.bf16.msra.mxu2 %v1315_v39 }
 0x662   : > { %1379 = vmatpush.bf16.msra.mxu2 %v1311_v44 }
 0x663   : > { %v1290_v7 = vpop.permute.xlu1 %1289 }
 0x664   : > { %v1302_v56 = vpop.permute.xlu0 %1301  ;;  %v1416_v52 = vpop.permute.xlu2 %1415 }
 0x665   : > { %v1313_v54 = vsel %vm1307_vm0, %v1300_v26, %v1302_v56  ;;  %v1314_v36 = vsel %vm1307_vm0, %v1302_v56, %v1304_v57  ;;  %2515 = vmatmul.msk.bf16.vlgmr.msra.gmra.mxu2 %vm1326_vm7, %v3902_v13 }
 0x666   : > { %1481 = vmatpush.bf16.msrb.mxu2 %v1432_v21  ;;  %1350 = vmatpush.bf16.msra.mxu0 %v1313_v54 }
 0x667   : > { %1364 = vmatpush.bf16.msra.mxu1 %v1314_v36 }
 0x66a   : > { %1482 = vmatpush.bf16.msrb.mxu2 %v1428_v14 }
 0x66b   : > { %v1418_v6 = vpop.permute.xlu1 %1417 }
 0x66c   : > { %v1292_v4 = vpop.permute.xlu0 %1291  ;;  %v1430_v46 = vsel %vm1425_vm6, %v1416_v52, %v1418_v6  ;;  %v1431_v63 = vsel %vm1425_vm6, %v1418_v6, %v1420_v0  ;;  %v1729_v32 = vpop.permute.xlu2 %1728 }
 0x66d   : > { %v1309_v60 = vsel %vm1307_vm0, %v1290_v7, %v1292_v4  ;;  %v1310_v1 = vsel %vm1307_vm0, %v1292_v4, %v1294_v18  ;;  %v1741_v5 = vsel %vm1736_vm10, %v1727_v35, %v1729_v32  ;;  %v1714_v18 = vld [vmem:[#allocation2 + $0x40] sm:$0xff] }
 0x66e   : > { %1653 = vmatpush.bf16.msra.mxu2 %v1617_v62  ;;  %1351 = vmatpush.bf16.msra.mxu0 %v1309_v60 }
 0x66f   : > { %1365 = vmatpush.bf16.msra.mxu1 %v1310_v1 }
 0x671   : > { %2513 = vmatmul.msk.bf16.vlgmr.msra.gmra.mxu0 %vm1326_vm7, %v3902_v13 }
 0x672   : > { %1453 = vmatpush.bf16.msrb.mxu0 %v1430_v46  ;;  %2514 = vmatmul.msk.bf16.vlgmr.msra.gmra.mxu1 %vm1326_vm7, %v3902_v13 }
 0x673   : > { %1467 = vmatpush.bf16.msrb.mxu1 %v1431_v63  ;;  %v1408_v51 = vpop.permute.xlu1 %1407 }
 0x674   : > { %v1288_v9 = vpop.permute.xlu0 %1287  ;;  %v1427_v45 = vsel %vm1425_vm6, %v1408_v51, %v1410_v50  ;;  %v1719_v23 = vpop.permute.xlu2 %1718 }
 0x675   : > { %2519 = vmatmul.msk.bf16.vlgmr.msrb.gmra.mxu2 %vm1326_vm7, %v1233_v22  ;;  %v1308_v59 = vsel %vm1307_vm0, %v1288_v9, %v1290_v7 }
 0x676   : > { %1337 = vmatpush.bf16.msrb.mxu3 %v1308_v59 }
 0x677   : > { %1468 = vmatpush.bf16.msrb.mxu1 %v1427_v45 }
 0x679   : > { %2512 = vmatmul.msk.bf16.vlgmr.msrb.gmra.mxu3 %vm1326_vm7, %v3902_v13 }
 0x67a   : > { %1392 = vmatpush.bf16.msra.mxu3 %v3880_v34  ;;  %v1713_v34 = vld [vmem:[#allocation2 + $0x38] sm:$0xff] }
 0x67b   : > { %v1717_v24 = vpop.permute.xlu1 %1716  ;;  %v1715_v0 = vpack.c.bf16 %v1714_v18, %v1713_v34  ;;  %v1860_v18 = vld [vmem:[#allocation2 + $0x58] sm:$0xff] }
 0x67c   : > { %v1596_v37 = vpop.permute.xlu0 %1595  ;;  %v1737_v29 = vsel %vm1736_vm10, %v1717_v24, %v1719_v23  ;;  %v1414_v48 = vpop.permute.xlu2 %1413 }
 0x67d   : > { %v1613_v25 = vsel %vm259_vm14, %v3906_v15, %v1596_v37  ;;  %v1429_v28 = vsel %vm1425_vm6, %v3896_v31, %v1414_v48 }
 0x67e   : > { %1393 = vmatpush.bf16.msra.mxu3 %v1296_v2  ;;  %1654 = vmatpush.bf16.msra.mxu2 %v1613_v25 }
 0x682   : > { %1764 = vmatpush.bf16.msrb.mxu2 %v1741_v5  ;;  %2518 = vmatmul.msk.bf16.vlgmr.msrb.gmra.mxu1 %vm1326_vm7, %v1233_v22 }
 0x683   : > { %v1592_v42 = vpop.permute.xlu1 %1591 }
 0x684   : > { %v1406_v11 = vpop.permute.xlu0 %1405  ;;  %v1612_v10 = vsel %vm259_vm14, %v1592_v42, %v3906_v15  ;;  %v1598_v38 = vpop.permute.xlu2 %1597 }
 0x685   : > { %2523 = vmatmul.msk.bf16.vlgmr.msra.gmra.mxu2 %vm1326_vm7, %v1570_v53  ;;  %v1426_v8 = vsel %vm1425_vm6, %v1406_v11, %v1408_v51  ;;  %v1614_v35 = vsel %vm259_vm14, %v1596_v37, %v1598_v38 }
 0x686   : > { %1765 = vmatpush.bf16.msrb.mxu2 %v1737_v29  ;;  %1454 = vmatpush.bf16.msrb.mxu0 %v1426_v8 }
 0x689   : > { %2517 = vmatmul.msk.bf16.vlgmr.msrb.gmra.mxu0 %vm1326_vm7, %v1233_v22  ;;  %2516 = vmatmul.msk.bf16.vlgmr.msra.gmra.mxu3 %vm1326_vm7, %v3902_v13 }
 0x68b   : > { %v1610_v55 = vpop.permute.xlu1 %1609 }
 0x68c   : > { %v1602_v12 = vpop.permute.xlu0 %1601  ;;  %v1733_v27 = vpop.permute.xlu2 %1732 }
 0x68d   : > { %v1616_v16 = vsel %vm259_vm14, %v1602_v12, %v3873_v17 }
 0x68e   : > { %1639 = vmatpush.bf16.msra.mxu1 %v1616_v16 }
 0x692   : > { %1640 = vmatpush.bf16.msra.mxu1 %v1612_v10 }
 0x693   : > { %v1731_v17 = vpop.permute.xlu1 %1730 }
 0x694   : > { %v1424_v40 = vpop.permute.xlu0 %1423  ;;  %v1742_v57 = vsel %vm1736_vm10, %v1729_v32, %v1731_v17  ;;  %v1723_v44 = vpop.permute.xlu2 %1722 }
 0x695   : > { %v1433_v50 = vsel %vm1425_vm6, %v3886_v58, %v1424_v40  ;;  %1509 = vmatpush.bf16.msra.mxu0 %v1424_v40  ;;  %2522 = vmatmul.msk.bf16.vlgmr.msra.gmra.mxu1 %vm1326_vm7, %v1570_v53  ;;  %v1861_v40 = vpack.c.bf16 %v1860_v18, %v1860_v18  ;;  %v1946_v18 = vld [vmem:[#allocation2 + $0x60] sm:$0x1] }
 0x696   : > { %1695 = vmatpush.bf16.msrb.mxu1 %v1610_v55  ;;  %2527 = vmatmul.msk.bf16.vlgmr.msrb.gmra.mxu2 %vm1326_vm7, %v1715_v0 }
 0x697   : > { %1495 = vmatpush.bf16.msrb.mxu3 %v1433_v50 }
 0x699   : > { %1510 = vmatpush.bf16.msra.mxu0 %v1414_v48 }
 0x69b   : > { %1496 = vmatpush.bf16.msrb.mxu3 %v1429_v28  ;;  %v1721_v31 = vpop.permute.xlu1 %1720 }
 0x69c   : > { %v1608_v2 = vpop.permute.xlu0 %1607  ;;  %2521 = vmatmul.msk.bf16.vlgmr.msra.gmra.mxu0 %vm1326_vm7, %v1233_v22  ;;  %v1738_v41 = vsel %vm1736_vm10, %v1719_v23, %v1721_v31  ;;  %v1739_v13 = vsel %vm1736_vm10, %v1721_v31, %v1723_v44  ;;  %v1848_v12 = vpop.permute.xlu2 %1847 }
 0x69d   : > { %v1618_v26 = vsel %vm259_vm14, %v3894_v49, %v1608_v2  ;;  %v1619_v58 = vsel %vm259_vm14, %v1608_v2, %v1610_v55  ;;  %v1743_v49 = vsel %vm1736_vm10, %v1731_v17, %v1733_v27 }
 0x69e   : > { %2520 = vmatmul.msk.bf16.vlgmr.msrb.gmra.mxu3 %vm1326_vm7, %v1233_v22  ;;  %1681 = vmatpush.bf16.msrb.mxu0 %v1619_v58 }
 0x69f   : > { %1667 = vmatpush.bf16.msra.mxu3 %v1618_v26 }
 0x6a3   : > { %1668 = vmatpush.bf16.msra.mxu3 %v1614_v35  ;;  %v1843_v16 = vpop.permute.xlu1 %1842 }
 0x6a4   : > { %v1600_v39 = vpop.permute.xlu0 %1599 }
 0x6a5   : > { %1696 = vmatpush.bf16.msrb.mxu1 %v1600_v39  ;;  %v1615_v3 = vsel %vm259_vm14, %v1598_v38, %v1600_v39 }
 0x6a6   : > { %1682 = vmatpush.bf16.msrb.mxu0 %v1615_v3 }
 0x6a7   : > { %1778 = vmatpush.bf16.msrb.mxu3 %v1742_v57 }
 0x6a8   : > { %2526 = vmatmul.msk.bf16.vlgmr.msrb.gmra.mxu1 %vm1326_vm7, %v1570_v53 }
 0x6aa   : > { %1792 = vmatpush.bf16.msra.mxu0 %v1743_v49 }
 0x6ab   : > { %1779 = vmatpush.bf16.msrb.mxu3 %v1738_v41 }
 0x6ac   : > { %v1735_v21 = vpop.permute.xlu0 %1734  ;;  %2525 = vmatmul.msk.bf16.vlgmr.msrb.gmra.mxu0 %vm1326_vm7, %v1570_v53 }
 0x6ad   : > { %v1744_v15 = vsel %vm1736_vm10, %v1733_v27, %v1735_v21  ;;  %1820 = vmatpush.bf16.msra.mxu2 %v1735_v21 }
 0x6ae   : > { %1793 = vmatpush.bf16.msra.mxu0 %v1739_v13  ;;  %2524 = vmatmul.msk.bf16.vlgmr.msra.gmra.mxu3 %vm1326_vm7, %v1570_v53 }
 0x6af   : > { %1806 = vmatpush.bf16.msra.mxu1 %v1744_v15 }
 0x6b4   : > { %v1725_v7 = vpop.permute.xlu0 %1724 }
 0x6b5   : > { %1821 = vmatpush.bf16.msra.mxu2 %v1725_v7  ;;  %v1740_v56 = vsel %vm1736_vm10, %v1723_v44, %v1725_v7 }
 0x6b6   : > { %1807 = vmatpush.bf16.msra.mxu1 %v1740_v56 }
 0x6b8   : > { %2531 = vmatmul.msk.bf16.vlgmr.msra.gmra.mxu2 %vm1326_vm7, %v1715_v0 }
 0x6b9   : > { %2530 = vmatmul.msk.bf16.vlgmr.msra.gmra.mxu1 %vm1326_vm7, %v1715_v0 }
 0x6bc   : > { %2529 = vmatmul.msk.bf16.vlgmr.msra.gmra.mxu0 %vm1326_vm7, %v1715_v0 }
 0x6be   : > { %2528 = vmatmul.msk.bf16.vlgmr.msrb.gmra.mxu3 %vm1326_vm7, %v1715_v0 }
 0x6e8   : > { %v1381_v54 = vpop.f32.mrf.mxu2 }
 0x6ee   : > { %v3971_v62 = vpop.f32.mrf.mxu0 }
 0x6ef   : > { %v1367_v36 = vpop.f32.mrf.mxu1 }
 0x6f0   : > { %v1383_v14 = vpop.f32.mrf.mxu2 }
 0x6f6   : > { %v3973_v1 = vpop.f32.mrf.mxu0 }
 0x6f7   : > { %v1369_v6 = vpop.f32.mrf.mxu1 }
 0x6f8   : > { %v1484_v4 = vpop.f32.mrf.mxu2 }
 0x6f9   : > { %v1485_v52 = vadd.f32 %v1484_v4, %v1367_v36 }
 0x6fc   : > { %v1339_v60 = vpop.f32.mrf.mxu3 }
 0x6ff   : > { %v1470_v63 = vpop.f32.mrf.mxu1 }
 0x700   : > { %v1486_v46 = vpop.f32.mrf.mxu2 }
 0x701   : > { %v1487_v13 = vadd.f32 %v1486_v46, %v1369_v6 }
 0x704   : > { %v1341_v61 = vpop.f32.mrf.mxu3 }
 0x706   : > { %v1456_v20 = vpop.f32.mrf.mxu0 }
 0x707   : > { %v3977_v51 = vpop.f32.mrf.mxu1  ;;  %v1457_v37 = vadd.f32 %v1456_v20, %v1339_v60 }
 0x708   : > { %v3975_v22 = vpop.f32.mrf.mxu2 }
 0x70c   : > { %v1395_v9 = vpop.f32.mrf.mxu3 }
 0x70e   : > { %v1458_v45 = vpop.f32.mrf.mxu0 }
 0x70f   : > { %v1459_v23 = vadd.f32 %v1458_v45, %v1341_v61 }
 0x710   : > { %v3979_v59 = vpop.f32.mrf.mxu2 }
 0x712   : > { %v1642_v32 = vpop.f32.mrf.mxu1 }
 0x713   : > { %v1703_v19 = vadd.f32 %v1642_v32, %v1457_v37  ;;  %v1471_v32 = vadd.f32 %v1470_v63, %v3971_v62 }
 0x714   : > { %v1397_v24 = vpop.f32.mrf.mxu3 }
 0x719   : > { %v1767_v25 = vpop.f32.mrf.mxu2  ;;  %v1512_v5 = vpop.f32.mrf.mxu0 }
 0x71a   : > { %v1644_v47 = vpop.f32.mrf.mxu1  ;;  %v1828_v53 = vadd.f32 %v1767_v25, %v1703_v19  ;;  %v1513_v57 = vadd.f32 %v1512_v5, %v1395_v9  ;;  %v1473_v25 = vadd.f32 %v3977_v51, %v3973_v1  ;;  %v1704_v5 = vadd.f32 %v3975_v22, %v1471_v32 }
 0x71b   : > { %v1708_v29 = vadd.f32 %v1644_v47, %v1459_v23 }
 0x71c   : > { %v3981_v55 = vadd.f32 %v1843_v16, %v1828_v53  ;;  %v1709_v47 = vadd.f32 %v3979_v59, %v1473_v25  ;;  %v1871_v59 = vpop.permute.xlu0 %1870 }
 0x721   : > { %v1498_v11 = vpop.f32.mrf.mxu3  ;;  %v1769_v42 = vpop.f32.mrf.mxu2 }
 0x722   : > { %v1514_v8 = vpop.f32.mrf.mxu0  ;;  %v1833_v48 = vadd.f32 %v1769_v42, %v1708_v29  ;;  %v1499_v27 = vadd.f32 %v1498_v11, %v1381_v54 }
 0x723   : > { %v1515_v49 = vadd.f32 %v1514_v8, %v1397_v24 }
 0x724   : > { %v3983_v34 = vadd.f32 %v1848_v12, %v1833_v48 }
 0x725   : > { %v1698_v10 = vpop.f32.mrf.mxu1 }
 0x726   : > { %v1862_v0 = vpack.c.bf16 %v3983_v34, %v3981_v55  ;;  %v1707_v21 = vadd.f32 %v1698_v10, %v1513_v57 }
 0x728   : > { %1883 = vmatpush.bf16.msra.mxu3 %v1862_v0 }
 0x729   : > { %v1500_v38 = vpop.f32.mrf.mxu3 }
 0x72a   : > { %v1684_v50 = vpop.f32.mrf.mxu0  ;;  %v1501_v31 = vadd.f32 %v1500_v38, %v1383_v14 }
 0x72b   : > { %2532 = vmatmul.msk.bf16.vlgmr.msra.gmra.mxu3 %vm693_vm9, %v1861_v40  ;;  %v1706_v39 = vadd.f32 %v1684_v50, %v1499_v27 }
 0x72d   : > { %v1700_v17 = vpop.f32.mrf.mxu1 }
 0x72e   : > { %v1712_v36 = vadd.f32 %v1700_v17, %v1515_v49 }
 0x731   : > { %v1670_v28 = vpop.f32.mrf.mxu3 }
 0x732   : > { %v1686_v2 = vpop.f32.mrf.mxu0  ;;  %v1705_v15 = vadd.f32 %v1670_v28, %v1485_v52 }
 0x733   : > { %v1711_v41 = vadd.f32 %v1686_v2, %v1501_v31 }
 0x736   : > { %v1809_v26 = vpop.f32.mrf.mxu1 }
 0x737   : > { %v1831_v44 = vadd.f32 %v1809_v26, %v1706_v39 }
 0x739   : > { %v1672_v58 = vpop.f32.mrf.mxu3  ;;  %v3988_v20 = vadd.f32 %v1843_v16, %v1831_v44 }
 0x73a   : > { %v1795_v35 = vpop.f32.mrf.mxu0  ;;  %v1710_v4 = vadd.f32 %v1672_v58, %v1487_v13 }
 0x73b   : > { %v1823_v3 = vpop.f32.mrf.mxu2  ;;  %v1830_v60 = vadd.f32 %v1795_v35, %v1705_v15 }
 0x73c   : > { %v1832_v14 = vadd.f32 %v1823_v3, %v1707_v21 }
 0x73d   : > { %v3995_v52 = vadd.f32 %v1843_v16, %v1830_v60  ;;  %v1957_v60 = vpop.permute.xlu1 %1956 }
 0x73e   : > { %v1811_v7 = vpop.f32.mrf.mxu1  ;;  %v4002_v19 = vadd.f32 %v1843_v16, %v1832_v14 }
 0x73f   : > { %v1836_v56 = vadd.f32 %v1811_v7, %v1711_v41 }
 0x741   : > { %v1781_v61 = vpop.f32.mrf.mxu3  ;;  %v3990_v54 = vadd.f32 %v1848_v12, %v1836_v56 }
 0x742   : > { %v1797_v9 = vpop.f32.mrf.mxu0  ;;  %v1829_v23 = vadd.f32 %v1781_v61, %v1704_v5 }
 0x743   : > { %v1835_v45 = vadd.f32 %v1797_v9, %v1710_v4  ;;  %v1865_v6 = vpack.c.bf16 %v3990_v54, %v3988_v20  ;;  %v1825_v46 = vpop.f32.mrf.mxu2 }
 0x744   : > { %v1837_v37 = vadd.f32 %v1825_v46, %v1712_v36  ;;  %v4012_v22 = vadd.f32 %v1843_v16, %v1829_v23 }
 0x745   : > { %v3997_v24 = vadd.f32 %v1848_v12, %v1835_v45  ;;  %1922 = vmatpush.bf16.msrb.mxu2 %v1865_v6 }
 0x746   : > { %v4006_v63 = vadd.f32 %v1848_v12, %v1837_v37 }
 0x747   : > { %v1864_v62 = vpack.c.bf16 %v3997_v24, %v3995_v52 }
 0x748   : > { %v1866_v53 = vpack.c.bf16 %v4006_v63, %v4002_v19  ;;  %2535 = vmatmul.msk.bf16.vlgmr.msrb.gmra.mxu2 %vm693_vm9, %v1861_v40 }
 0x749   : > { %v1783_v29 = vpop.f32.mrf.mxu3  ;;  %1909 = vmatpush.bf16.msrb.mxu1 %v1864_v62 }
 0x74a   : > { %v1834_v1 = vadd.f32 %v1783_v29, %v1709_v47  ;;  %1935 = vmatpush.bf16.msrb.mxu3 %v1866_v53 }
 0x74c   : > { %v4014_v51 = vadd.f32 %v1848_v12, %v1834_v1  ;;  %2534 = vmatmul.msk.bf16.vlgmr.msrb.gmra.mxu1 %vm693_vm9, %v1861_v40  ;;  %v1947_v12 = vpack.c.bf16 %v1946_v18, %v1946_v18 }
 0x74d   : > { %2536 = vmatmul.msk.bf16.vlgmr.msrb.gmra.mxu3 %vm693_vm9, %v1861_v40 }
 0x74e   : > { %v1863_v11 = vpack.c.bf16 %v4014_v51, %v4012_v22 }
 0x750   : > { %1896 = vmatpush.bf16.msrb.mxu0 %v1863_v11 }
 0x753   : > { %2533 = vmatmul.msk.bf16.vlgmr.msrb.gmra.mxu0 %vm693_vm9, %v1861_v40 }
 0x7ae   : > { %v1885_v42 = vpop.f32.mrf.mxu3 }
 0x7af   : > { %v1886_v8 = vadd.f32 %v1885_v42, %v1871_v59 }
 0x7b1   : > { %v1941_v48 = vmax.f32 %v1886_v8, 0.0 }
 0x7b3   : > { %v1948_v10 = vpack.c.bf16 %v1941_v48, %v1941_v48 }
 0x7b5   : > { %v1963_v16 = vsel %vm596_vm5, %v1948_v10, 0  ;;  %v2152_v10 = vld [vmem:[#allocation2 + $0x68] sm:$0x7] }
 0x7b6   : > { %v1887_v0 = vpop.f32.mrf.mxu3  ;;  %1984 = vmatpush.bf16.msra.mxu0 %v1963_v16 }
 0x7b9   : > { %2537 = vmatmul.msk.bf16.vlgmr.msra.gmra.mxu0 %vm775_vm4, %v1947_v12 }
 0x7c9   : > { %v1911_v38 = vpop.f32.mrf.mxu1 }
 0x7ca   : > { %v1912_v50 = vadd.f32 %v1911_v38, %v1871_v59 }
 0x7cb   : > { %v1924_v28 = vpop.f32.mrf.mxu2 }
 0x7cc   : > { %v1943_v17 = vmax.f32 %v1912_v50, 0.0  ;;  %v1925_v2 = vadd.f32 %v1924_v28, %v1871_v59 }
 0x7ce   : > { %v1950_v26 = vpack.c.bf16 %v1943_v17, %v1943_v17  ;;  %v1944_v40 = vmax.f32 %v1925_v2, 0.0 }
 0x7d0   : > { %v1898_v58 = vpop.f32.mrf.mxu0  ;;  %v1969_v27 = vsel %vm596_vm5, %v1950_v26, 0  ;;  %v1951_v35 = vpack.c.bf16 %v1944_v40, %v1944_v40  ;;  %v1937_v31 = vpop.f32.mrf.mxu3  ;;  %v4033_v26 = vpack.c.bf16 %v2152_v10, %v2152_v10 }
 0x7d1   : > { %v1899_v57 = vadd.f32 %v1898_v58, %v1871_v59  ;;  %2010 = vmatpush.bf16.msra.mxu2 %v1969_v27  ;;  %v1913_v39 = vpop.f32.mrf.mxu1  ;;  %v1938_v3 = vadd.f32 %v1937_v31, %v1871_v59 }
 0x7d2   : > { %v1972_v41 = vsel %vm596_vm5, %v1951_v35, 0 }
 0x7d3   : > { %v1942_v49 = vmax.f32 %v1899_v57, 0.0  ;;  %v1945_v44 = vmax.f32 %v1938_v3, 0.0  ;;  %2023 = vmatpush.bf16.msra.mxu3 %v1972_v41  ;;  %v1926_v13 = vpop.f32.mrf.mxu2 }
 0x7d4   : > { %2539 = vmatmul.msk.bf16.vlgmr.msra.gmra.mxu2 %vm775_vm4, %v1947_v12 }
 0x7d5   : > { %v1949_v21 = vpack.c.bf16 %v1942_v49, %v1942_v49  ;;  %v1952_v15 = vpack.c.bf16 %v1945_v44, %v1945_v44 }
 0x7d6   : > { %2540 = vmatmul.msk.bf16.vlgmr.msra.gmra.mxu3 %vm775_vm4, %v1947_v12 }
 0x7d7   : > { %v1966_v7 = vsel %vm596_vm5, %v1949_v21, 0  ;;  %v1975_v56 = vsel %vm596_vm5, %v1952_v15, 0 }
 0x7d8   : > { %1997 = vmatpush.bf16.msra.mxu1 %v1966_v7  ;;  %v1900_v36 = vpop.f32.mrf.mxu0  ;;  %2036 = vmatpush.bf16.msrb.mxu0 %v1975_v56  ;;  %v1939_v4 = vpop.f32.mrf.mxu3 }
 0x7db   : > { %2538 = vmatmul.msk.bf16.vlgmr.msra.gmra.mxu1 %vm775_vm4, %v1947_v12  ;;  %2541 = vmatmul.msk.bf16.vlgmr.msrb.gmra.mxu0 %vm775_vm4, %v1947_v12 }
 0x836   : > { %v1986_v61 = vpop.f32.mrf.mxu0 }
 0x837   : > { %v1987_v9 = vadd.f32 %v1986_v61, %v1957_v60 }
 0x839   : > { %v2542_v14 = vmul.f32 -1.442695, %v1987_v9 }
 0x83b   : > { %2863 = vpow2.f32 %v2542_v14 }
 0x83e   : > { %v1988_v45 = vpop.f32.mrf.mxu0 }
 0x841   : > { %v2864_v32 = vpop.eup %2863 }
 0x842   : > { %v2057_v6 = vadd.f32 1.0, %v2864_v32 }
 0x844   : > { %2865 = vrcp.f32 %v2057_v6  ;;  %v2073_v5 = vand.u32 2147483648, %v2057_v6  ;;  %v2071_v47 = vand.u32 2147483647, %v2057_v6  ;;  %vm2067_vm1 = vweird.f32 %v2057_v6 }
 0x846   : > { %v2074_v53 = vor.u32 1.1754944e-38, %v2073_v5  ;;  %vm2072_vm4 = vcmp.eq.f32.partialorder %v2071_v47, 8.507059e+37 }
 0x84a   : > { %v2866_v46 = vpop.eup %2865 }
 0x84b   : > { %v2063_v37 = vmul.f32 %v2866_v46, %v2057_v6  ;;  %vm2068_vm14 = vweird.f32 %v2866_v46 }
 0x84c   : > { %vm2069_vm11 = vmor %vm2067_vm1, %vm2068_vm14 }
 0x84d   : > { %v2064_v25 = vsub.f32 1.0, %v2063_v37 }
 0x84f   : > { %v2065_v62 = vmul.f32 %v2866_v46, %v2064_v25 }
 0x851   : > { %v2066_v23 = vadd.f32 %v2866_v46, %v2065_v62 }
 0x853   : > { %v2070_v29 = vsel %vm2069_vm11, %v2866_v46, %v2066_v23 }
 0x854   : > { %v2075_v1 = vsel %vm2072_vm4, %v2074_v53, %v2070_v29 }
 0x855   : > { %v2137_v11 = vperm.slane %v2075_v1, 0 }
 0x857   : > { %v2012_v59 = vpop.f32.mrf.mxu2  ;;  %v2142_v48 = vmul.f32 %v2137_v11, %v3981_v55  ;;  %v2147_v18 = vmul.f32 %v2137_v11, %v3983_v34 }
 0x858   : > { %v2013_v42 = vadd.f32 %v2012_v59, %v1957_v60  ;;  %v1999_v8 = vpop.f32.mrf.mxu1  ;;  %v2038_v12 = vpop.f32.mrf.mxu0 }
 0x859   : > { %v2000_v16 = vadd.f32 %v1999_v8, %v1957_v60  ;;  %v2039_v38 = vadd.f32 %v2038_v12, %v1957_v60  ;;  %v2025_v50 = vpop.f32.mrf.mxu3  ;;  %v2154_v17 = vpack.c.bf16 %v2147_v18, %v2142_v48 }
 0x85a   : > { %v2544_v0 = vmul.f32 -1.442695, %v2013_v42  ;;  %v2026_v2 = vadd.f32 %v2025_v50, %v1957_v60 }
 0x85b   : > { %v2543_v28 = vmul.f32 -1.442695, %v2000_v16  ;;  %v2546_v40 = vmul.f32 -1.442695, %v2039_v38  ;;  %2175 = vmatpush.bf16.msrb.mxu1 %v2154_v17 }
 0x85c   : > { %2867 = vpow2.f32 %v2544_v0  ;;  %v2545_v58 = vmul.f32 -1.442695, %v2026_v2 }
 0x85d   : > { %2869 = vpow2.f32 %v2543_v28 }
 0x85e   : > { %2871 = vpow2.f32 %v2546_v40  ;;  %2547 = vmatmul.msk.bf16.vlgmr.msrb.gmra.mxu1 %vm693_vm9, %v4033_v26 }
 0x85f   : > { %2873 = vpow2.f32 %v2545_v58  ;;  %v2014_v55 = vpop.f32.mrf.mxu2 }
 0x860   : > { %v2001_v34 = vpop.f32.mrf.mxu1  ;;  %v2040_v27 = vpop.f32.mrf.mxu0 }
 0x861   : > { %v2027_v57 = vpop.f32.mrf.mxu3 }
 0x862   : > { %v2868_v35 = vpop.eup %2867 }
 0x863   : > { %v2870_v31 = vpop.eup %2869  ;;  %v2059_v39 = vadd.f32 1.0, %v2868_v35 }
 0x864   : > { %v2872_v3 = vpop.eup %2871  ;;  %v2058_v49 = vadd.f32 1.0, %v2870_v31 }
 0x865   : > { %v2874_v41 = vpop.eup %2873  ;;  %2875 = vrcp.f32 %v2059_v39  ;;  %v2061_v44 = vadd.f32 1.0, %v2872_v3  ;;  %v2103_v15 = vand.u32 2147483648, %v2059_v39  ;;  %v2101_v7 = vand.u32 2147483647, %v2059_v39 }
 0x866   : > { %2877 = vrcp.f32 %v2058_v49  ;;  %v2060_v13 = vadd.f32 1.0, %v2874_v41  ;;  %vm2097_vm2 = vweird.f32 %v2059_v39  ;;  %vm2082_vm13 = vweird.f32 %v2058_v49 }
 0x867   : > { %2879 = vrcp.f32 %v2061_v44  ;;  %v2088_v61 = vand.u32 2147483648, %v2058_v49  ;;  %vm2127_vm15 = vweird.f32 %v2061_v44  ;;  %v2133_v9 = vand.u32 2147483648, %v2061_v44 }
 0x868   : > { %2881 = vrcp.f32 %v2060_v13  ;;  %vm2112_vm8 = vweird.f32 %v2060_v13  ;;  %v2118_v6 = vand.u32 2147483648, %v2060_v13  ;;  %vm4037_vm12 = vcmp.eq.f32.partialorder %v2101_v7, 8.507059e+37 }
 0x869   : > { %v2104_v5 = vor.u32 1.1754944e-38, %v2103_v15  ;;  %v2086_v23 = vand.u32 2147483647, %v2058_v49  ;;  %v2089_v1 = vor.u32 1.1754944e-38, %v2088_v61  ;;  %v2131_v42 = vand.u32 2147483647, %v2061_v44 }
 0x86a   : > { %v2116_v18 = vand.u32 2147483647, %v2060_v13  ;;  %v2134_v12 = vor.u32 1.1754944e-38, %v2133_v9  ;;  %v2119_v0 = vor.u32 1.1754944e-38, %v2118_v6 }
 0x86b   : > { %v2876_v21 = vpop.eup %2875  ;;  %vm2087_vm1 = vcmp.eq.f32.partialorder %v2086_v23, 8.507059e+37  ;;  %vm2132_vm4 = vcmp.eq.f32.partialorder %v2131_v42, 8.507059e+37 }
 0x86c   : > { %v2878_v56 = vpop.eup %2877  ;;  %v2093_v36 = vmul.f32 %v2876_v21, %v2059_v39  ;;  %vm2098_vm3 = vweird.f32 %v2876_v21 }
 0x86d   : > { %v2880_v4 = vpop.eup %2879  ;;  %v2078_v60 = vmul.f32 %v2878_v56, %v2058_v49  ;;  %vm2083_vm0 = vweird.f32 %v2878_v56  ;;  %vm2099_vm7 = vmor %vm2097_vm2, %vm2098_vm3 }
 0x86e   : > { %v2882_v14 = vpop.eup %2881  ;;  %v2094_v45 = vsub.f32 1.0, %v2093_v36  ;;  %v2123_v32 = vmul.f32 %v2880_v4, %v2061_v44  ;;  %vm2128_vm6 = vweird.f32 %v2880_v4  ;;  %vm2084_vm14 = vmor %vm2082_vm13, %vm2083_vm0  ;;  %vm2117_vm13 = vcmp.eq.f32.partialorder %v2116_v18, 8.507059e+37 }
 0x86f   : > { %v2079_v46 = vsub.f32 1.0, %v2078_v60  ;;  %v2108_v37 = vmul.f32 %v2882_v14, %v2060_v13  ;;  %vm2113_vm10 = vweird.f32 %v2882_v14  ;;  %vm2129_vm11 = vmor %vm2127_vm15, %vm2128_vm6  ;;  %vm2388_vm0 = vcmask 531456  }
 0x870   : > { %v2095_v62 = vmul.f32 %v2876_v21, %v2094_v45  ;;  %v2124_v47 = vsub.f32 1.0, %v2123_v32  ;;  %vm2114_vm2 = vmor %vm2112_vm8, %vm2113_vm10 }
 0x871   : > { %v2080_v53 = vmul.f32 %v2878_v56, %v2079_v46  ;;  %v2109_v29 = vsub.f32 1.0, %v2108_v37 }
 0x872   : > { %v2125_v11 = vmul.f32 %v2880_v4, %v2124_v47  ;;  %v2096_v59 = vadd.f32 %v2876_v21, %v2095_v62 }
 0x873   : > { %v2110_v8 = vmul.f32 %v2882_v14, %v2109_v29  ;;  %v2081_v48 = vadd.f32 %v2878_v56, %v2080_v53 }
 0x874   : > { %v2100_v10 = vsel %vm2099_vm7, %v2876_v21, %v2096_v59  ;;  %v2126_v16 = vadd.f32 %v2880_v4, %v2125_v11 }
 0x875   : > { %v2105_v38 = vsel %vm4037_vm12, %v2104_v5, %v2100_v10  ;;  %v2085_v50 = vsel %vm2084_vm14, %v2878_v56, %v2081_v48  ;;  %v2111_v17 = vadd.f32 %v2882_v14, %v2110_v8 }
 0x876   : > { %v2139_v28 = vperm.slane %v2105_v38, 0  ;;  %v2090_v2 = vsel %vm2087_vm1, %v2089_v1, %v2085_v50  ;;  %v2130_v40 = vsel %vm2129_vm11, %v2880_v4, %v2126_v16  ;;  %vm2415_vm1 = vcmask 518144  }
 0x877   : > { %v2138_v58 = vperm.slane %v2090_v2, 0  ;;  %v2135_v55 = vsel %vm2132_vm4, %v2134_v12, %v2130_v40  ;;  %v2115_v34 = vsel %vm2114_vm2, %v2882_v14, %v2111_v17 }
 0x878   : > { %v2144_v27 = vmul.f32 %v2139_v28, %v3995_v52  ;;  %v2149_v35 = vmul.f32 %v2139_v28, %v3997_v24  ;;  %v2141_v57 = vperm.slane %v2135_v55, 0  ;;  %v2120_v31 = vsel %vm2117_vm13, %v2119_v0, %v2115_v34 }
 0x879   : > { %v2143_v39 = vmul.f32 %v2138_v58, %v4012_v22  ;;  %v2148_v3 = vmul.f32 %v2138_v58, %v4014_v51  ;;  %v2140_v49 = vperm.slane %v2120_v31, 0 }
 0x87a   : > { %v2156_v41 = vpack.c.bf16 %v2149_v35, %v2144_v27  ;;  %v2146_v44 = vmul.f32 %v2141_v57, %v4002_v19  ;;  %v2151_v13 = vmul.f32 %v2141_v57, %v4006_v63 }
 0x87b   : > { %v2155_v21 = vpack.c.bf16 %v2148_v3, %v2143_v39  ;;  %v2145_v15 = vmul.f32 %v2140_v49, %v3988_v20  ;;  %v2150_v7 = vmul.f32 %v2140_v49, %v3990_v54  ;;  %v4065_v20 = vpop.permute.xlu2 %2162 }
 0x87c   : > { %2201 = vmatpush.bf16.msrb.mxu3 %v2156_v41  ;;  %v2158_v52 = vpack.c.bf16 %v2151_v13, %v2146_v44 }
 0x87d   : > { %2188 = vmatpush.bf16.msrb.mxu2 %v2155_v21  ;;  %v2157_v24 = vpack.c.bf16 %v2150_v7, %v2145_v15 }
 0x87e   : > { %2227 = vmatpush.bf16.msra.mxu1 %v2158_v52 }
 0x87f   : > { %2549 = vmatmul.msk.bf16.vlgmr.msrb.gmra.mxu3 %vm693_vm9, %v4033_v26  ;;  %2214 = vmatpush.bf16.msra.mxu0 %v2157_v24 }
 0x880   : > { %2548 = vmatmul.msk.bf16.vlgmr.msrb.gmra.mxu2 %vm693_vm9, %v4033_v26 }
 0x881   : > { %2551 = vmatmul.msk.bf16.vlgmr.msra.gmra.mxu1 %vm693_vm9, %v4033_v26 }
 0x882   : > { %2550 = vmatmul.msk.bf16.vlgmr.msra.gmra.mxu0 %vm693_vm9, %v4033_v26  ;;  %vm4150_vm9 = vcmask 1048064  }
 0x883   : > { %vm4151_vm15 = vmmov %vm4150_vm9 }
 0x884   : > { %vm4152_vm8 = vmmov %vm4150_vm9 }
 0x885   : > { %vm4153_vm12 = vmmov %vm4152_vm8 }
 0x886   : > { %vm4154_vm3 = vmmov %vm4152_vm8 }
 0x8db   : > { %v2177_v54 = vpop.f32.mrf.mxu1 }
 0x8dc   : > { %v2178_v19 = vadd.f32 %v2177_v54, %v4065_v20 }
 0x8de   : > { %v2238_v63 = vrot.slane %v2178_v19, 1  ;;  %v2253_v51 = vrot.slane %v2178_v19, 2 }
 0x8e0   : > { %v2248_v22 = vmax.f32 %v2178_v19, %v2238_v63 }
 0x8e2   : > { %v2263_v56 = vmax.f32 %v2248_v22, %v2253_v51 }
 0x8e3   : > { %v2179_v36 = vpop.f32.mrf.mxu1 }
 0x8e4   : > { %v2268_v4 = vperm.slane %v2263_v56, 0 }
 0x8e6   : > { %v2273_v60 = vsub.f32 %v2178_v19, %v2268_v4 }
 0x8e8   : > { %v2278_v61 = vmul.f32 1.442695, %v2273_v60 }
 0x8ea   : > { %2883 = vpow2.f32 %v2278_v61 }
 0x8f0   : > { %v2884_v9 = vpop.eup %2883 }
 0x8f1   : > { %v2293_v14 = vrot.slane %v2884_v9, 1  ;;  %v2308_v32 = vrot.slane %v2884_v9, 2 }
 0x8f3   : > { %v2303_v45 = vadd.f32 %v2884_v9, %v2293_v14 }
 0x8f5   : > { %v2318_v6 = vadd.f32 %v2308_v32, %v2303_v45 }
 0x8f7   : > { %2885 = vrcp.f32 %v2318_v6 }
 0x8fd   : > { %v2886_v26 = vpop.eup %2885 }
 0x8fe   : > { %v4068_v46 = vpop.f32.mrf.mxu1  ;;  %v2328_v25 = vperm.slane %v2886_v26, 0 }
 0x8ff   : > { %v2216_v37 = vpop.f32.mrf.mxu0  ;;  %v2230_v6 = vadd.f32 %v4068_v46, %v4065_v20 }
 0x900   : > { %v2217_v5 = vadd.f32 %v2216_v37, %v4065_v20  ;;  %v4071_v62 = vmul.f32 %v2884_v9, %v2328_v25 }
 0x901   : > { %v2242_v26 = vrot.slane %v2230_v6, 1  ;;  %v2257_v25 = vrot.slane %v2230_v6, 2 }
 0x902   : > { %v2241_v47 = vrot.slane %v2217_v5, 1  ;;  %v2203_v23 = vpop.f32.mrf.mxu3  ;;  %2338 = vrot.lane.b32.xlu0 %v4071_v62, %s2948_s25  ;;  %v2256_v11 = vrot.slane %v2217_v5, 2 }
 0x903   : > { %v2204_v53 = vadd.f32 %v2203_v23, %v4065_v20  ;;  %v2190_v29 = vpop.f32.mrf.mxu2  ;;  %v2252_v37 = vmax.f32 %v2230_v6, %v2242_v26 }
 0x904   : > { %v2251_v1 = vmax.f32 %v2217_v5, %v2241_v47  ;;  %v2191_v59 = vadd.f32 %v2190_v29, %v4065_v20 }
 0x905   : > { %v2240_v42 = vrot.slane %v2204_v53, 1  ;;  %v2255_v16 = vrot.slane %v2204_v53, 2 }
 0x906   : > { %v2266_v8 = vmax.f32 %v2251_v1, %v2256_v11  ;;  %v2239_v48 = vrot.slane %v2191_v59, 1  ;;  %v2231_v18 = vpop.f32.mrf.mxu1  ;;  %v2254_v50 = vrot.slane %v2191_v59, 2 }
 0x907   : > { %v2250_v10 = vmax.f32 %v2204_v53, %v2240_v42  ;;  %v2218_v12 = vpop.f32.mrf.mxu0 }
 0x908   : > { %v2271_v0 = vperm.slane %v2266_v8, 0  ;;  %v2249_v38 = vmax.f32 %v2191_v59, %v2239_v48 }
 0x909   : > { %v2265_v17 = vmax.f32 %v2250_v10, %v2255_v16 }
 0x90a   : > { %v2276_v28 = vsub.f32 %v2217_v5, %v2271_v0  ;;  %v2264_v2 = vmax.f32 %v2249_v38, %v2254_v50  ;;  %v2205_v40 = vpop.f32.mrf.mxu3  ;;  %v2267_v5 = vmax.f32 %v2252_v37, %v2257_v25 }
 0x90b   : > { %v2270_v58 = vperm.slane %v2265_v17, 0  ;;  %v2192_v55 = vpop.f32.mrf.mxu2 }
 0x90c   : > { %v2284_v34 = vmul.f32 1.442695, %v2276_v28  ;;  %v2269_v27 = vperm.slane %v2264_v2, 0  ;;  %v2272_v47 = vperm.slane %v2267_v5, 0  ;;  %v1058_v2 = vadd.s32 128, %v3605_v43 }
 0x90d   : > { %v2275_v35 = vsub.f32 %v2204_v53, %v2270_v58 }
 0x90e   : > { %2887 = vpow2.f32 %v2284_v34  ;;  %v2274_v57 = vsub.f32 %v2191_v59, %v2269_v27  ;;  %v2277_v23 = vsub.f32 %v2230_v6, %v2272_v47  ;;  %v2354_v40 = vand.u32 1, %v1058_v2 }
 0x90f   : > { %v2282_v31 = vmul.f32 1.442695, %v2275_v35  ;;  %v2353_v27 = vand.u32 1, %v3605_v43 }
 0x910   : > { %v2280_v39 = vmul.f32 1.442695, %v2274_v57  ;;  %v2286_v53 = vmul.f32 1.442695, %v2277_v23  ;;  %vm2359_vm6 = vcmp.eq.s32.totalorder %v2354_v40, 0 }
 0x911   : > { %2889 = vpow2.f32 %v2282_v31  ;;  %vm2358_vm7 = vcmp.eq.s32.totalorder %v2353_v27, 0 }
 0x912   : > { %2891 = vpow2.f32 %v2280_v39 }
 0x914   : > { %v2888_v3 = vpop.eup %2887 }
 0x915   : > { %v2296_v49 = vrot.slane %v2888_v3, 1  ;;  %v2311_v13 = vrot.slane %v2888_v3, 2 }
 0x917   : > { %v2890_v41 = vpop.eup %2889  ;;  %v2306_v44 = vadd.f32 %v2888_v3, %v2296_v49 }
 0x918   : > { %v2892_v21 = vpop.eup %2891  ;;  %v2295_v15 = vrot.slane %v2890_v41, 1  ;;  %v2310_v54 = vrot.slane %v2890_v41, 2 }
 0x919   : > { %v2321_v7 = vadd.f32 %v2311_v13, %v2306_v44  ;;  %v2294_v52 = vrot.slane %v2892_v21, 1  ;;  %v2309_v63 = vrot.slane %v2892_v21, 2  ;;  %v2357_v44 = vand.u32 1, %v3627_v30 }
 0x91a   : > { %v2305_v24 = vadd.f32 %v2890_v41, %v2295_v15 }
 0x91b   : > { %2893 = vrcp.f32 %v2321_v7  ;;  %v2304_v19 = vadd.f32 %v2892_v21, %v2294_v52  ;;  %vm2362_vm10 = vcmp.eq.s32.totalorder %v2357_v44, 0 }
 0x91c   : > { %v2320_v22 = vadd.f32 %v2310_v54, %v2305_v24 }
 0x91d   : > { %v2319_v51 = vadd.f32 %v2309_v63, %v2304_v19 }
 0x91e   : > { %2895 = vrcp.f32 %v2320_v22 }
 0x91f   : > { %2897 = vrcp.f32 %v2319_v51 }
 0x920   : > { %2899 = vpow2.f32 %v2286_v53 }
 0x921   : > { %v2894_v56 = vpop.eup %2893 }
 0x922   : > { %v2331_v36 = vperm.slane %v2894_v56, 0 }
 0x924   : > { %v2896_v4 = vpop.eup %2895  ;;  %v4077_v60 = vmul.f32 %v2888_v3, %v2331_v36 }
 0x925   : > { %v2898_v61 = vpop.eup %2897  ;;  %v2330_v9 = vperm.slane %v2896_v4, 0 }
 0x926   : > { %2345 = vrot.lane.b32.xlu0 %v4077_v60, %s2948_s25  ;;  %v2329_v14 = vperm.slane %v2898_v61, 0  ;;  %v2900_v29 = vpop.eup %2899 }
 0x927   : > { %v4081_v45 = vmul.f32 %v2890_v41, %v2330_v9  ;;  %v2297_v1 = vrot.slane %v2900_v29, 1  ;;  %v2312_v59 = vrot.slane %v2900_v29, 2  ;;  %v1060_v41 = vadd.s32 384, %v3605_v43 }
 0x928   : > { %v2334_v32 = vmul.f32 %v2892_v21, %v2329_v14  ;;  %v2355_v21 = vand.u32 1, %v3623_v33 }
 0x929   : > { %2343 = vrot.lane.b32.xlu2 %v4081_v45, %s2948_s25  ;;  %v2307_v11 = vadd.f32 %v2900_v29, %v2297_v1  ;;  %v2356_v13 = vand.u32 1, %v1060_v41 }
 0x92a   : > { %2341 = vrot.lane.b32.xlu1 %v2334_v32, %s2948_s25  ;;  %vm2360_vm11 = vcmp.eq.s32.totalorder %v2355_v21, 0 }
 0x92b   : > { %v2322_v42 = vadd.f32 %v2312_v59, %v2307_v11  ;;  %vm2361_vm14 = vcmp.eq.s32.totalorder %v2356_v13, 0 }
 0x92d   : > { %2901 = vrcp.f32 %v2322_v42 }
 0x933   : > { %v2902_v8 = vpop.eup %2901 }
 0x934   : > { %v2332_v48 = vperm.slane %v2902_v8, 0 }
 0x936   : > { %v2337_v18 = vmul.f32 %v2900_v29, %v2332_v48 }
 0x974   : > { %v2339_v10 = vpop.permute.xlu0 %2338 }
 0x975   : > { %v2340_v20 = vsel %vm4150_vm9, %v2339_v10, %v2337_v18 }
 0x976   : > { %2347 = vrot.lane.b32.xlu1 %v2340_v20, %s2948_s25  ;;  %s2555_s25 = smul.u32 20, %s4156_s16 }
 0x978   : > { %s184_s15 = scalar_lea.vmem %s4118_s3, %s2555_s25 }
 0x983   : > { %v2344_v46 = vpop.permute.xlu2 %2343 }
 0x998   : > { %v2346_v16 = vpop.permute.xlu0 %2345 }
 0x999   : > { %v2351_v12 = vsel %vm4151_vm15, %v2346_v16, %v2344_v46 }
 0x99a   : > { %2384 = vrot.lane.b32.xlu1 %v2351_v12, %s2970_s11 }
 0x99c   : > { %v2342_v0 = vpop.permute.xlu1 %2341 }
 0x99d   : > { %v2350_v38 = vsel %vm4152_vm8, %v2344_v46, %v2342_v0  ;;  %v2349_v50 = vsel %vm4153_vm12, %v2342_v0, %v2339_v10 }
 0x99e   : > { %2382 = vrot.lane.b32.xlu0 %v2350_v38, %s2970_s11  ;;  %2380 = vrot.lane.b32.xlu2 %v2349_v50, %s2970_s11 }
 0x9a6   : > { %2378 = vrot.lane.b32.xlu0 %v2340_v20, %s2970_s11 }
 0x9e8   : > { %v2348_v17 = vpop.permute.xlu1 %2347 }
 0x9e9   : > { %v2352_v28 = vsel %vm4154_vm3, %v2348_v17, %v2346_v16 }
 0x9ea   : > { %2386 = vrot.lane.b32.xlu2 %v2352_v28, %s2970_s11 }
 0x9f8   : > { %v2381_v55 = vpop.permute.xlu2 %2380 }
 0xa0c   : > { %v2385_v15 = vpop.permute.xlu1 %2384 }
 0xa10   : > { %v2383_v58 = vpop.permute.xlu0 %2382 }
 0xa11   : > { %v2390_v34 = vsel %vm2388_vm0, %v2381_v55, %v2383_v58  ;;  %v2391_v52 = vsel %vm2388_vm0, %v2383_v58, %v2385_v15 }
 0xa12   : > { %v2399_v35 = vsel %vm2359_vm6, %v2334_v32, %v2390_v34  ;;  %v2400_v30 = vsel %vm2360_vm11, %v4081_v45, %v2391_v52 }
 0xa13   : > { %v2407_v31 = vrot.slane %v2399_v35, 4 }
 0xa18   : > { %v2379_v57 = vpop.permute.xlu0 %2378 }
 0xa19   : > { %v2389_v39 = vsel %vm2388_vm0, %v2379_v57, %v2381_v55 }
 0xa1a   : > { %v2398_v3 = vsel %vm2358_vm7, %v4071_v62, %v2389_v39 }
 0xa1b   : > { %v2409_v49 = vsel %vm596_vm5, %v2398_v3, %v2407_v31 }
 0xa1c   : > { %2413 = vst [vmem:[%s184_s15] sm:$0x77] %v2409_v49 }
 0xa44   : > { %v2387_v7 = vpop.permute.xlu2 %2386 }
 0xa45   : > { %v2392_v62 = vsel %vm2388_vm0, %v2385_v15, %v2387_v7  ;;  %v2402_v24 = vsel %vm2362_vm10, %v2337_v18, %v2387_v7 }
 0xa46   : > { %v2401_v54 = vsel %vm2361_vm14, %v4077_v60, %v2392_v62  ;;  %2416 = vst.msk [vmem:[%s184_s15 + $0x10] sm:$0x7] %vm2415_vm1, %v2402_v24 }
 0xa47   : > { %v2408_v43 = vrot.slane %v2401_v54, 4 }
 0xa49   : > { %v2410_v19 = vsel %vm596_vm5, %v2400_v30, %v2408_v43 }
 0xa4a   : > { %2414 = vst [vmem:[%s184_s15 + $0x8] sm:$0x77] %v2410_v19 }
 0xa4b PF: > { %s14_s12 = sadd.s32 1, %s2943_s12  }
 0xa4c   : > { %p11_p7 = scmp.ge.s32.totalorder %s14_s12, 4  }
 0xa4e   :  { %13 = sbr.rel (!%p11_p7) target bundleno = 1 (0x1), region = 67 }
 0xa53   :  { %2438 = vsyncpa [#allocation3], 1 }
 0xa54   :  { %2440 = vsyncpa [#allocation3 + $0x1], 1 }

</bundles_post_ra>
